<compile_context>
chip_gen: v7x
topology: tpu7x:2x2x1
jax: 0.10.0
libtpu: 0.0.40
codegen_flags: <defaults>
</compile_context>

<pallas_src>
import jax
import jax.numpy as jnp
from jax.experimental import pallas as pl
from jax.experimental.pallas import tpu as pltpu


def mlp_kernel(x_ref, w1_ref, b1_ref, w2_ref, b2_ref, w3_ref, b3_ref,
               w4_ref, b4_ref, o_ref):
    # Feature-major: features on sublanes, batch on lanes (lane-dense).
    x = x_ref[...]                                    # (2, tile_n)
    w1 = w1_ref[...]                                  # (128, 2)

    # layer1 + relu: K=2, so use VPU broadcast-FMAs (skip a near-empty MXU push).
    h = w1[:, 0:1] * x[0:1, :] + w1[:, 1:2] * x[1:2, :] + b1_ref[...]
    h = jnp.maximum(h, 0.0)                           # (128, tile_n)

    # layer2 + relu (MXU)
    h = jnp.dot(w2_ref[...], h, preferred_element_type=jnp.float32) + b2_ref[...]
    h = jnp.maximum(h, 0.0)                           # (64, tile_n)

    # layer3 + relu (MXU)
    h = jnp.dot(w3_ref[...], h, preferred_element_type=jnp.float32) + b3_ref[...]
    h = jnp.maximum(h, 0.0)                           # (16, tile_n)

    # output layer (no activation)
    h = jnp.dot(w4_ref[...], h, preferred_element_type=jnp.float32) + b4_ref[...]
    o_ref[...] = h.astype(o_ref.dtype)                # (3, tile_n)


def _choose_tile(n, tile_n):
    """Round tile to a multiple of 128; keep >=2 grid steps when possible (v7x)."""
    tile_n = max(128, (tile_n // 128) * 128)
    half = max(128, pl.cdiv(n, 2 * 128) * 128)        # ~ceil(n/2), 128-aligned
    return min(tile_n, half)


def _vmem_budget(tile_n):
    """Rough per-tile VMEM estimate (bytes) with 2x headroom, clamped."""
    io_tiles = 2 * 2 * 8 * tile_n * 4                 # x/out tiles, double-buffered,
                                                      # sublanes padded 2/3 -> 8
    intermediates = (128 + 64 + 16) * tile_n * 4      # f32 activations
    weights = 2 * 4 * (128 * 128 + 64 * 128 + 16 * 128 + 8 * 128 + 4 * 8 * 128)
    est = io_tiles + intermediates + weights
    return int(min(max(2 * est, 8 << 20), 32 << 20))


def simple_nn_forward(x, params, *, tile_n=2048):
    """x: (N, 2) float32.  params: PyTorch-layout weights/biases.  Returns (N, 3)."""
    N, F_in = x.shape
    assert F_in == 2

    w1, b1 = params["w1"], params["b1"]   # (128, 2), (128, 1)
    w2, b2 = params["w2"], params["b2"]   # (64, 128), (64, 1)
    w3, b3 = params["w3"], params["b3"]   # (16, 64), (16, 1)
    w4, b4 = params["w4"], params["b4"]   # (3, 16),  (3, 1)

    tn = _choose_tile(N, tile_n)
    n_pad = pl.cdiv(N, tn) * tn

    xt = x.T                               # (2, N): batch onto the lane axis
    if n_pad != N:
        xt = jnp.pad(xt, ((0, 0), (0, n_pad - N)))

    grid = (n_pad // tn,)

    def full(arr):
        # whole weight/bias array, VMEM-resident across all grid steps
        return pl.BlockSpec(arr.shape, lambda i: (0, 0))

    out_t = pl.pallas_call(
        mlp_kernel,
        out_shape=jax.ShapeDtypeStruct((3, n_pad), jnp.float32),
        grid_spec=pltpu.PrefetchScalarGridSpec(
            num_scalar_prefetch=0,
            grid=grid,
            in_specs=[
                pl.BlockSpec((F_in, tn), lambda i: (0, i)),   # x tile (2, tn)
                full(w1), full(b1),
                full(w2), full(b2),
                full(w3), full(b3),
                full(w4), full(b4),
            ],
            out_specs=pl.BlockSpec((3, tn), lambda i: (0, i)),  # lane-dense out
        ),
        compiler_params=pltpu.CompilerParams(
            dimension_semantics=("parallel",),
            vmem_limit_bytes=_vmem_budget(tn),
        ),
    )(xt, w1, b1, w2, b2, w3, b3, w4, b4)

    return out_t[:, :N].T                  # back to (N, 3) for the caller


def init_params(key):
    """Deterministic init matching nn.Linear's U(-1/sqrt(fan_in), 1/sqrt(fan_in)).

    Weights in PyTorch layout (out_features, in_features); biases as (out, 1).
    """
    dims = [(2, 128), (128, 64), (64, 16), (16, 3)]
    params = {}
    keys = jax.random.split(key, 2 * len(dims))
    for idx, (fan_in, fan_out) in enumerate(dims):
        bound = 1.0 / jnp.sqrt(jnp.float32(fan_in))
        w = jax.random.uniform(keys[2 * idx], (fan_out, fan_in),
                               minval=-bound, maxval=bound, dtype=jnp.float32)
        b = jax.random.uniform(keys[2 * idx + 1], (fan_out, 1),
                               minval=-bound, maxval=bound, dtype=jnp.float32)
        params[f"w{idx + 1}"] = w
        params[f"b{idx + 1}"] = b
    return params


def reference_forward(x, params):
    h = jnp.maximum(x @ params["w1"].T + params["b1"][:, 0], 0.0)
    h = jnp.maximum(h @ params["w2"].T + params["b2"][:, 0], 0.0)
    h = jnp.maximum(h @ params["w3"].T + params["b3"][:, 0], 0.0)
    return h @ params["w4"].T + params["b4"][:, 0]


if __name__ == "__main__":
    key = jax.random.PRNGKey(0)
    k_param, k_x = jax.random.split(key)

    params = init_params(k_param)

    # Batch of 2000 points in [-0.5, 2.5]^2, matching the script's
    # np.random.uniform range; 2000 also exercises the padding / cdiv path
    # (tile_n -> 1024, grid of 2 steps).
    N = 2000
    x = jax.random.uniform(k_x, (N, 2), minval=-0.5, maxval=2.5,
                           dtype=jnp.float32)

    out = simple_nn_forward(x, params)
    out = jax.block_until_ready(out)

    ref = reference_forward(x, params)
    assert out.shape == (N, 3)
    assert jnp.allclose(out, ref, atol=1e-4, rtol=1e-4)

    print("KERNEL_OK")
</pallas_src>

<mosaic_0001>
module attributes {stable_mosaic.version = 11 : i64} {
  func.func @mlp_kernel(%arg0: i32, %arg1: memref<2x1024xf32, #tpu.memory_space<vmem>>, %arg2: memref<128x2xf32, #tpu.memory_space<vmem>>, %arg3: memref<128x1xf32, #tpu.memory_space<vmem>>, %arg4: memref<64x128xf32, #tpu.memory_space<vmem>>, %arg5: memref<64x1xf32, #tpu.memory_space<vmem>>, %arg6: memref<16x64xf32, #tpu.memory_space<vmem>>, %arg7: memref<16x1xf32, #tpu.memory_space<vmem>>, %arg8: memref<3x16xf32, #tpu.memory_space<vmem>>, %arg9: memref<3x1xf32, #tpu.memory_space<vmem>>, %arg10: memref<3x1024xf32, #tpu.memory_space<vmem>>) attributes {dimension_semantics = [#tpu.dimension_semantics<parallel>], iteration_bounds = array<i64: 2>, scalar_prefetch = 0 : i64, scratch_operands = 0 : i64, tpu.core_type = #tpu.core_type<tc>, window_params = [{transform_indices = @transform_0, window_bounds = array<i64: 2, 1024>}, {pipeline_mode = #tpu.pipeline_mode<synchronous>, transform_indices = @transform_1, window_bounds = array<i64: 128, 2>}, {pipeline_mode = #tpu.pipeline_mode<synchronous>, transform_indices = @transform_2, window_bounds = array<i64: 128, 1>}, {pipeline_mode = #tpu.pipeline_mode<synchronous>, transform_indices = @transform_3, window_bounds = array<i64: 64, 128>}, {pipeline_mode = #tpu.pipeline_mode<synchronous>, transform_indices = @transform_4, window_bounds = array<i64: 64, 1>}, {pipeline_mode = #tpu.pipeline_mode<synchronous>, transform_indices = @transform_5, window_bounds = array<i64: 16, 64>}, {pipeline_mode = #tpu.pipeline_mode<synchronous>, transform_indices = @transform_6, window_bounds = array<i64: 16, 1>}, {pipeline_mode = #tpu.pipeline_mode<synchronous>, transform_indices = @transform_7, window_bounds = array<i64: 3, 16>}, {pipeline_mode = #tpu.pipeline_mode<synchronous>, transform_indices = @transform_8, window_bounds = array<i64: 3, 1>}, {transform_indices = @transform_9, window_bounds = array<i64: 3, 1024>}]} {
    %c0 = arith.constant 0 : index
    %c0_0 = arith.constant 0 : index
    %0 = vector.load %arg1[%c0, %c0_0] : memref<2x1024xf32, #tpu.memory_space<vmem>>, vector<2x1024xf32>
    %c0_1 = arith.constant 0 : index
    %c0_2 = arith.constant 0 : index
    %1 = vector.load %arg2[%c0_1, %c0_2] : memref<128x2xf32, #tpu.memory_space<vmem>>, vector<128x2xf32>
    %2 = vector.extract_strided_slice %1 {offsets = [0, 0], sizes = [128, 1], strides = [1, 1]} : vector<128x2xf32> to vector<128x1xf32>
    %3 = vector.extract_strided_slice %0 {offsets = [0, 0], sizes = [1, 1024], strides = [1, 1]} : vector<2x1024xf32> to vector<1x1024xf32>
    %4 = vector.broadcast %2 : vector<128x1xf32> to vector<128x1024xf32>
    %5 = vector.broadcast %3 : vector<1x1024xf32> to vector<128x1024xf32>
    %6 = arith.mulf %4, %5 : vector<128x1024xf32>
    %7 = vector.extract_strided_slice %1 {offsets = [0, 1], sizes = [128, 1], strides = [1, 1]} : vector<128x2xf32> to vector<128x1xf32>
    %8 = vector.extract_strided_slice %0 {offsets = [1, 0], sizes = [1, 1024], strides = [1, 1]} : vector<2x1024xf32> to vector<1x1024xf32>
    %9 = vector.broadcast %7 : vector<128x1xf32> to vector<128x1024xf32>
    %10 = vector.broadcast %8 : vector<1x1024xf32> to vector<128x1024xf32>
    %11 = arith.mulf %9, %10 : vector<128x1024xf32>
    %12 = arith.addf %6, %11 : vector<128x1024xf32>
    %c0_3 = arith.constant 0 : index
    %c0_4 = arith.constant 0 : index
    %13 = vector.load %arg3[%c0_3, %c0_4] : memref<128x1xf32, #tpu.memory_space<vmem>>, vector<128x1xf32>
    %14 = vector.broadcast %13 : vector<128x1xf32> to vector<128x1024xf32>
    %15 = arith.addf %12, %14 : vector<128x1024xf32>
    %cst = arith.constant 0.000000e+00 : f32
    %16 = vector.broadcast %cst : f32 to vector<128x1024xf32>
    %17 = arith.maximumf %15, %16 : vector<128x1024xf32>
    %c0_5 = arith.constant 0 : index
    %c0_6 = arith.constant 0 : index
    %18 = vector.load %arg4[%c0_5, %c0_6] : memref<64x128xf32, #tpu.memory_space<vmem>>, vector<64x128xf32>
    %cst_7 = arith.constant dense<0.000000e+00> : vector<64x1024xf32>
    %19 = tpu.matmul %18, %17, %cst_7 {dimension_numbers = #tpu.dot_dimension_numbers<[1], [0], [0], [1], [0, 0, 1, 1], [], []>} : vector<64x128xf32>, vector<128x1024xf32>, vector<64x1024xf32> -> vector<64x1024xf32>
    %c0_8 = arith.constant 0 : index
    %c0_9 = arith.constant 0 : index
    %20 = vector.load %arg5[%c0_8, %c0_9] : memref<64x1xf32, #tpu.memory_space<vmem>>, vector<64x1xf32>
    %21 = vector.broadcast %20 : vector<64x1xf32> to vector<64x1024xf32>
    %22 = arith.addf %19, %21 : vector<64x1024xf32>
    %cst_10 = arith.constant 0.000000e+00 : f32
    %23 = vector.broadcast %cst_10 : f32 to vector<64x1024xf32>
    %24 = arith.maximumf %22, %23 : vector<64x1024xf32>
    %c0_11 = arith.constant 0 : index
    %c0_12 = arith.constant 0 : index
    %25 = vector.load %arg6[%c0_11, %c0_12] : memref<16x64xf32, #tpu.memory_space<vmem>>, vector<16x64xf32>
    %cst_13 = arith.constant dense<0.000000e+00> : vector<16x1024xf32>
    %26 = tpu.matmul %25, %24, %cst_13 {dimension_numbers = #tpu.dot_dimension_numbers<[1], [0], [0], [1], [0, 0, 1, 1], [], []>} : vector<16x64xf32>, vector<64x1024xf32>, vector<16x1024xf32> -> vector<16x1024xf32>
    %c0_14 = arith.constant 0 : index
    %c0_15 = arith.constant 0 : index
    %27 = vector.load %arg7[%c0_14, %c0_15] : memref<16x1xf32, #tpu.memory_space<vmem>>, vector<16x1xf32>
    %28 = vector.broadcast %27 : vector<16x1xf32> to vector<16x1024xf32>
    %29 = arith.addf %26, %28 : vector<16x1024xf32>
    %cst_16 = arith.constant 0.000000e+00 : f32
    %30 = vector.broadcast %cst_16 : f32 to vector<16x1024xf32>
    %31 = arith.maximumf %29, %30 : vector<16x1024xf32>
    %c0_17 = arith.constant 0 : index
    %c0_18 = arith.constant 0 : index
    %32 = vector.load %arg8[%c0_17, %c0_18] : memref<3x16xf32, #tpu.memory_space<vmem>>, vector<3x16xf32>
    %cst_19 = arith.constant dense<0.000000e+00> : vector<3x1024xf32>
    %33 = tpu.matmul %32, %31, %cst_19 {dimension_numbers = #tpu.dot_dimension_numbers<[1], [0], [0], [1], [0, 0, 1, 1], [], []>} : vector<3x16xf32>, vector<16x1024xf32>, vector<3x1024xf32> -> vector<3x1024xf32>
    %c0_20 = arith.constant 0 : index
    %c0_21 = arith.constant 0 : index
    %34 = vector.load %arg9[%c0_20, %c0_21] : memref<3x1xf32, #tpu.memory_space<vmem>>, vector<3x1xf32>
    %35 = vector.broadcast %34 : vector<3x1xf32> to vector<3x1024xf32>
    %36 = arith.addf %33, %35 : vector<3x1024xf32>
    %c0_22 = arith.constant 0 : index
    %c0_23 = arith.constant 0 : index
    %37 = vector.load %arg10[%c0_22, %c0_23] : memref<3x1024xf32, #tpu.memory_space<vmem>>, vector<3x1024xf32>
    tpu.vector_store %arg10[%c0_22, %c0_23], %36 {strides = array<i32>} : memref<3x1024xf32, #tpu.memory_space<vmem>>, vector<3x1024xf32>,
    return
  }
  func.func @transform_0(%arg0: i32) -> (i32, i32) {
    %c0_i32 = arith.constant 0 : i32
    %c0_i32_0 = arith.constant 0 : i32
    return %c0_i32, %arg0 : i32, i32
  }
  func.func @transform_1(%arg0: i32) -> (i32, i32) {
    %c0_i32 = arith.constant 0 : i32
    %c0_i32_0 = arith.constant 0 : i32
    %c0_i32_1 = arith.constant 0 : i32
    return %c0_i32, %c0_i32_0 : i32, i32
  }
  func.func @transform_2(%arg0: i32) -> (i32, i32) {
    %c0_i32 = arith.constant 0 : i32
    %c0_i32_0 = arith.constant 0 : i32
    %c0_i32_1 = arith.constant 0 : i32
    return %c0_i32, %c0_i32_0 : i32, i32
  }
  func.func @transform_3(%arg0: i32) -> (i32, i32) {
    %c0_i32 = arith.constant 0 : i32
    %c0_i32_0 = arith.constant 0 : i32
    %c0_i32_1 = arith.constant 0 : i32
    return %c0_i32, %c0_i32_0 : i32, i32
  }
  func.func @transform_4(%arg0: i32) -> (i32, i32) {
    %c0_i32 = arith.constant 0 : i32
    %c0_i32_0 = arith.constant 0 : i32
    %c0_i32_1 = arith.constant 0 : i32
    return %c0_i32, %c0_i32_0 : i32, i32
  }
  func.func @transform_5(%arg0: i32) -> (i32, i32) {
    %c0_i32 = arith.constant 0 : i32
    %c0_i32_0 = arith.constant 0 : i32
    %c0_i32_1 = arith.constant 0 : i32
    return %c0_i32, %c0_i32_0 : i32, i32
  }
  func.func @transform_6(%arg0: i32) -> (i32, i32) {
    %c0_i32 = arith.constant 0 : i32
    %c0_i32_0 = arith.constant 0 : i32
    %c0_i32_1 = arith.constant 0 : i32
    return %c0_i32, %c0_i32_0 : i32, i32
  }
  func.func @transform_7(%arg0: i32) -> (i32, i32) {
    %c0_i32 = arith.constant 0 : i32
    %c0_i32_0 = arith.constant 0 : i32
    %c0_i32_1 = arith.constant 0 : i32
    return %c0_i32, %c0_i32_0 : i32, i32
  }
  func.func @transform_8(%arg0: i32) -> (i32, i32) {
    %c0_i32 = arith.constant 0 : i32
    %c0_i32_0 = arith.constant 0 : i32
    %c0_i32_1 = arith.constant 0 : i32
    return %c0_i32, %c0_i32_0 : i32, i32
  }
  func.func @transform_9(%arg0: i32) -> (i32, i32) {
    %c0_i32 = arith.constant 0 : i32
    %c0_i32_0 = arith.constant 0 : i32
    return %c0_i32, %arg0 : i32, i32
  }
}

</mosaic_0001>

<bundles_post_ra>
// kernel: tpu_custom_call.1
= control target key start
LH: loop header
LB: loop body
LE: loop exit
PB: predicated region body
PF: predicated region fallthrough
CT: control target
= control target key end

     0   :  { %14 = vsyncpa [#allocation3], 0  ;;  %s4760_s0 = inlined_call_operand.vmem [shape: f32[2,2048], index: 0, kind: input, shape index: {}]   ;;  %s4761_s1 = inlined_call_operand.vmem [shape: f32[128,2], index: 1, kind: input, shape index: {}]   ;;  %s4762_s2 = inlined_call_operand.vmem [shape: f32[128,1], index: 2, kind: input, shape index: {}]   ;;  %s4763_s3 = inlined_call_operand.vmem [shape: f32[64,128], index: 3, kind: input, shape index: {}]   ;;  %s4764_s4 = inlined_call_operand.vmem [shape: f32[64,1], index: 4, kind: input, shape index: {}]   ;;  %s4765_s5 = inlined_call_operand.vmem [shape: f32[16,64], index: 5, kind: input, shape index: {}]   ;;  %s4766_s6 = inlined_call_operand.vmem [shape: f32[16,1], index: 6, kind: input, shape index: {}]   ;;  %s4767_s7 = inlined_call_operand.vmem [shape: f32[3,16], index: 7, kind: input, shape index: {}]   ;;  %s4768_s8 = inlined_call_operand.vmem [shape: f32[3,1], index: 8, kind: input, shape index: {}]   ;;  %s4769_s9 = inlined_call_operand.hbm [shape: f32[3,2048], index: 9, kind: output, shape index: {}]  }
   0x1   :  { %16 = vsyncpa [#allocation3 + $0x1], 0  ;;  %s3095_s30 = smov 0   ;;  %s3097_s10 = smov 0  }
   0x2   :  { %s3099_s11 = smov 0   ;;  %s3101_s12 = smov 0  }
   0x3 LB: > { %s3116_s13 = sadd.s32 4294967295, %s3039_s12   ;;  %s2684_s14 = sadd.s32 4294967294, %s3039_s12   ;;  %s3039_s12 = sphi %s3101_s12, %s5023_s12   ;;  %s3035_s11 = sphi %s3099_s11, %s5022_s11   ;;  %s3031_s10 = sphi %s3097_s10, %s5021_s10   ;;  %s3027_s30 = sphi %s3095_s30, %s5020_s30  }
   0x4   : > { %s3120_s15 = sadd.s32 1, %s3039_s12   ;;  %s223_s16 = sadd.s32 1, %s3035_s11 }
   0x5   : > { %s220_s17 = ssub.s32 %s3039_s12, %s3120_s15  ;;  %p233_p0 = scmp.ne.s32.totalorder %s3035_s11, %s3031_s10 }
   0x6   : > { %p221_p1 = scmp.eq.s32.totalorder %s220_s17, 0  ;;  %p234_p2 = scmp.eq.s32.totalorder %s3116_s13, 1 }
   0x7   : > { %p239_p3 = scmp.ne.s32.totalorder %s3031_s10, %s3027_s30  ;;  %p240_p4 = scmp.eq.s32.totalorder %s2684_s14, 1 }
   0x8   : > { %s3131_s18 = scalar_select %p221_p1, %s3035_s11, %s223_s16  }
   0x9   : > { %p3133_p5 = por %p234_p2, %p233_p0  ;;  %p3137_p6 = por %p240_p4, %p239_p3 }
   0xa   : > { %p2687_p7 = scmp.ge.s32.totalorder %s3039_s12, 1  ;;  %p291_p8 = scmp.lt.s32.totalorder %s3039_s12, 3 }
   0xc   : > { %p292_p9 = pnand %p2687_p7, %p291_p8 }
   0xe   : > { %295 = sbr.rel (%p292_p9) target bundleno = 1056 (0x420), region = 56 }
  0x15   : > { %v3146_v0 = vld [vmem:[%s4761_s1 + $0x10] sm:$0xff]  ;;  %v336_v1 = vld [vmem:[%s4761_s1] sm:$0xff]  ;;  %s2689_s25 = sshll.u32 %s3116_s13, 3  ;;  %v3041_v2 = vmov 1   ;;  %v337_v4 = vld [vmem:[%s4761_s1 + $0x8] sm:$0xff]  ;;  %v434_v5 = vlaneseq  ;;  %v3042_v9 = vmov 0  }
  0x16   : > { %2961 = vset.pattern.permute.xlu0 %v3041_v2  ;;  %2959 = vset.pattern.permute.xlu1 %v3041_v2  ;;  %p328_p10 = scmp.lt.s32.totalorder %s2689_s25, 15  ;;  %v340_v3 = vld [vmem:[%s4761_s1 + $0x20] sm:$0xff]  ;;  %v342_v6 = vld [vmem:[%s4761_s1 + $0x30] sm:$0xff]  ;;  %v339_v7 = vld [vmem:[%s4761_s1 + $0x18] sm:$0xff]  ;;  %vm1964_vm0 = vcmask 523264   ;;  %vm2302_vm1 = vcmask 130048  }
  0x17   : > { %643 = vperm.xlu0 %2961, %v3146_v0   ;;  %635 = vperm.xlu1 %2959, %v336_v1   ;;  %v3167_v8 = vshrl.u32 %v434_v5, 7  ;;  %v3173_v10 = vld [vmem:[%s4761_s1 + $0x40] sm:$0xff]  ;;  %v3189_v15 = vld [vmem:[%s4761_s1 + $0x50] sm:$0xff]  ;;  %v341_v27 = vld [vmem:[%s4761_s1 + $0x28] sm:$0xff]  ;;  %s324_s16 = sand.u32 1, %s3031_s10   ;;  %s2708_s21 = sshll.u32 %s3116_s13, 9 }
  0x18   : > { %s5025_s25 = smov (!%p328_p10, %s2689_s25), 15  ;;  %v1026_v17 = vld [vmem:[%s4762_s2] sm:$0xff]  ;;  %v3218_v24 = vld [vmem:[%s4761_s1 + $0x70] sm:$0xff]  ;;  %v1027_v37 = vld [vmem:[%s4762_s2 + $0x8] sm:$0xff]  ;;  %s2688_s17 = sshll.u32 %s324_s16, 5 }
  0x19   : > { %s2690_s22 = sshll.u32 %s5025_s25, 1  ;;  %v444_v11 = vsub.s32 4, %v3167_v8  ;;  %v704_v13 = vsub.s32 3, %v3167_v8  ;;  %v708_v14 = vsub.s32 5, %v3167_v8  ;;  %v3198_v18 = vsub.s32 1, %v3167_v8  ;;  %v3207_v21 = vld [vmem:[%s4761_s1 + $0x60] sm:$0xff]  ;;  %s4716_s26 = scalar_lea.hbm %s4769_s9, %s2708_s21 }
  0x1a   : > { %s3178_s28 = scalar_lea.vmem %s4760_s0, %s2690_s22  ;;  %v440_v22 = vsub.s32 2, %v3167_v8  ;;  %v3221_v25 = vsub.s32 0, %v3167_v8  ;;  %v712_v28 = vsub.s32 7, %v3167_v8  ;;  %v448_v34 = vsub.s32 6, %v3167_v8  ;;  %v1028_v35 = vld [vmem:[%s4762_s2 + $0x10] sm:$0xff]  ;;  %v1029_v42 = vld [vmem:[%s4762_s2 + $0x18] sm:$0xff] }
  0x1b   : > { %651 = vperm.xlu0 %2961, %v340_v3   ;;  %639 = vperm.xlu1 %2959, %v337_v4   ;;  %v335_v12 = vld [vmem:[%s3178_s28 + $0x8] sm:$0xff]  ;;  %v343_v43 = vld [vmem:[%s4761_s1 + $0x38] sm:$0xff]  ;;  %v1030_v47 = vld [vmem:[%s4762_s2 + $0x20] sm:$0xff]  ;;  %s2611_s27 = scalar_lea.sflag [#allocation3], %s324_s16  ;;  %s3044_s13 = smov [#allocation2]  }
  0x1c   : > { %v461_v16 = vrot.slane %v335_v12, %v444_v11  ;;  %v725_v19 = vrot.slane %v335_v12, %v708_v14  ;;  %v721_v20 = vrot.slane %v335_v12, %v704_v13  ;;  %v457_v26 = vrot.slane %v335_v12, %v440_v22  ;;  %v1031_v44 = vld [vmem:[%s4762_s2 + $0x28] sm:$0xff]  ;;  %v1033_v46 = vld [vmem:[%s4762_s2 + $0x38] sm:$0xff]  ;;  %v1386_v52 = vld [vmem:[%s4764_s4] sm:$0xff]  ;;  %s2981_s29 = sshll.u32 %s3044_s13, 4  ;;  %s2982_s29 = int_to_ptr.vmem [resolvable:$false] %s2981_s29 }
  0x1d   : > { %v729_v30 = vrot.slane %v335_v12, %v712_v28  ;;  %v717_v32 = vrot.slane %v335_v12, %v3198_v18  ;;  %v465_v36 = vrot.slane %v335_v12, %v448_v34  ;;  %v453_v39 = vrot.slane %v335_v12, %v3221_v25  ;;  %v1035_v48 = vld [vmem:[%s4762_s2 + $0x48] sm:$0xff]  ;;  %v1037_v49 = vld [vmem:[%s4762_s2 + $0x58] sm:$0xff]  ;;  %v1032_v53 = vld [vmem:[%s4762_s2 + $0x30] sm:$0xff]  ;;  %s2983_s14 = scalar_lea.vmem %s2982_s29, 1024 }
  0x1e   : > { %v3212_v23 = vrot.slane %v721_v20, %v3198_v18  ;;  %v3231_v29 = vrot.slane %v457_v26, %v3221_v25  ;;  %v3260_v40 = vrot.slane %v725_v19, %v3198_v18  ;;  %v3275_v45 = vrot.slane %v461_v16, %v3221_v25  ;;  %v345_v50 = vld [vmem:[%s4761_s1 + $0x48] sm:$0xff]  ;;  %v1388_v54 = vld [vmem:[%s4764_s4 + $0x10] sm:$0xff]  ;;  %v1390_v55 = vld [vmem:[%s4764_s4 + $0x20] sm:$0xff] }
  0x1f   : > { %659 = vperm.xlu0 %2961, %v342_v6   ;;  %2960 = vset.pattern.permute.xlu1 %v3042_v9  ;;  %v3237_v31 = vrot.slane %v729_v30, %v3198_v18  ;;  %v3242_v33 = vrot.slane %v717_v32, %v3198_v18  ;;  %v3256_v38 = vrot.slane %v465_v36, %v3221_v25  ;;  %v1039_v51 = vld [vmem:[%s4762_s2 + $0x68] sm:$0xff]  ;;  %v347_v56 = vld [vmem:[%s4761_s1 + $0x58] sm:$0xff]  ;;  %v1392_v57 = vld [vmem:[%s4764_s4 + $0x30] sm:$0xff] }
  0x20   : > { %369 = vperm.xlu1 %2960, %v339_v7   ;;  %4832 = vst [vmem:[#allocation5_spill] sm:$0xff] %v3212_v23  ;;  %4835 = vst [vmem:[#allocation8_spill] sm:$0xff] %v3260_v40  ;;  %v3263_v41 = vrot.slane %v453_v39, %v3221_v25  ;;  %v1952_v58 = vld [vmem:[%s4766_s6] sm:$0xff]  ;;  %v349_v61 = vld [vmem:[%s4761_s1 + $0x68] sm:$0xff] }
  0x21   : > { %4833 = vst [vmem:[#allocation6_spill] sm:$0xff] %v3237_v31  ;;  %4834 = vst [vmem:[#allocation7_spill] sm:$0xff] %v3242_v33  ;;  %v2296_v59 = vld [vmem:[%s4768_s8] sm:$0x7]  ;;  %v1036_v62 = vld [vmem:[%s4762_s2 + $0x50] sm:$0xff] }
  0x22   : > { %4836 = vst [vmem:[#allocation9_spill] sm:$0xff] %v3263_v41  ;;  %4837 = vst [vmem:[#allocation10_spill] sm:$0xff] %v3275_v45  ;;  %v1034_v60 = vld [vmem:[%s4762_s2 + $0x40] sm:$0xff]  ;;  %v351_v63 = vld [vmem:[%s4761_s1 + $0x78] sm:$0xff] }
  0x23   : > { %667 = vperm.xlu0 %2961, %v3173_v10   ;;  %v1040_v5 = vld [vmem:[%s4762_s2 + $0x70] sm:$0xff] }
  0x24   : > { %2962 = vset.pattern.permute.xlu1 %v3041_v2 }
  0x25   : > { %647 = vperm.xlu1 %2962, %v339_v7  }
  0x27   : > { %675 = vperm.xlu0 %2961, %v3189_v15  }
  0x29   : > { %2963 = vset.pattern.permute.xlu1 %v3042_v9 }
  0x2a   : > { %1044 = vperm.xlu1 %2963, %v1026_v17  }
  0x2b   : > { %683 = vperm.xlu0 %2961, %v3207_v21  }
  0x2e   : > { %374 = vperm.xlu1 %2963, %v340_v3  }
  0x2f   : > { %691 = vperm.xlu0 %2961, %v3218_v24  }
  0x32   : > { %379 = vperm.xlu1 %2963, %v341_v27  }
  0x33   : > { %2974 = vset.pattern.permute.xlu0 %v3042_v9 }
  0x34   : > { %354 = vperm.xlu0 %2974, %v336_v1   ;;  %v334_v1 = vld [vmem:[%s3178_s28] sm:$0xff]  ;;  %s326_s28 = scalar_lea.vmem [#allocation2], %s2688_s17 }
  0x35   : > { %v713_v7 = vrot.slane %v334_v1, %v712_v28  ;;  %v437_v28 = vrot.slane %v334_v1, %v3221_v25  ;;  %v445_v30 = vrot.slane %v334_v1, %v444_v11  ;;  %s2625_s22 = sshll.u32 %s326_s28, 4  ;;  %s4718_s22 = int_to_ptr.vmem [resolvable:$true] %s2625_s22 }
  0x36   : > { %2964 = vset.pattern.permute.xlu1 %v3041_v2  ;;  %s2977_s25 = scalar_lea.vmem %s4718_s22, 512  ;;  %p2984_p0 = scmp.lt.s32.totalorder %s4718_s22, %s2982_s29 }
  0x37   : > { %655 = vperm.xlu1 %2964, %v341_v27   ;;  %v449_v27 = vrot.slane %v334_v1, %v448_v34  ;;  %p2978_p11 = scmp.ne.s32.totalorder %s4718_s22, %s2977_s25  ;;  %p2985_p1 = scmp.lt.s32.totalorder %s2983_s14, %s2977_s25 }
  0x38   : > { %359 = vperm.xlu0 %2974, %v337_v4  }
  0x39   : > { %p2979_p12 = pnand %p2978_p11, %p3133_p5  ;;  %p2986_p2 = por %p2985_p1, %p2984_p0 }
  0x3b   : > { %2965 = vset.pattern.permute.xlu1 %v3042_v9  ;;  %p2980_p13 = pneg %p2979_p12 }
  0x3c   : > { %364 = vperm.xlu0 %2974, %v3146_v0   ;;  %1054 = vperm.xlu1 %2965, %v1028_v35   ;;  %v1038_v0 = vld [vmem:[%s4762_s2 + $0x60] sm:$0xff]  ;;  %v3400_v35 = vrot.slane %v713_v7, %v3198_v18 }
  0x3d   : > { %p2987_p3 = pnand %p2986_p2, %p2980_p13 }
  0x40   : > { %1049 = vperm.xlu0 %2974, %v1027_v37   ;;  %384 = vperm.xlu1 %2965, %v342_v6   ;;  %v705_v6 = vrot.slane %v334_v1, %v704_v13 }
  0x42   : > { %v3389_v26 = vrot.slane %v705_v6, %v3198_v18 }
  0x44   : > { %1059 = vperm.xlu0 %2974, %v1029_v42   ;;  %389 = vperm.xlu1 %2965, %v343_v43  }
  0x48   : > { %1069 = vperm.xlu0 %2974, %v1031_v44   ;;  %2966 = vset.pattern.permute.xlu1 %v3041_v2 }
  0x49   : > { %663 = vperm.xlu1 %2966, %v343_v43  }
  0x4c   : > { %1079 = vperm.xlu0 %2974, %v1033_v46  }
  0x4d   : > { %2967 = vset.pattern.permute.xlu1 %v3042_v9 }
  0x4e   : > { %1064 = vperm.xlu1 %2967, %v1030_v47  }
  0x50   : > { %1089 = vperm.xlu0 %2974, %v1035_v48   ;;  %v1387_v48 = vld [vmem:[%s4764_s4 + $0x8] sm:$0xff] }
  0x52   : > { %394 = vperm.xlu1 %2967, %v3173_v10   ;;  %v701_v10 = vrot.slane %v334_v1, %v3198_v18 }
  0x54   : > { %1099 = vperm.xlu0 %2974, %v1037_v49   ;;  %v3403_v36 = vrot.slane %v701_v10, %v3198_v18 }
  0x56   : > { %399 = vperm.xlu1 %2967, %v345_v50  }
  0x58   : > { %1109 = vperm.xlu0 %2974, %v1039_v51   ;;  %v3444_v51 = vrot.slane %v437_v28, %v3221_v25 }
  0x5a   : > { %2968 = vset.pattern.permute.xlu1 %v3041_v2 }
  0x5b   : > { %671 = vperm.xlu1 %2968, %v345_v50   ;;  %v3441_v50 = vrot.slane %v449_v27, %v3221_v25 }
  0x5c   : > { %1396 = vperm.xlu0 %2974, %v1386_v52   ;;  %v3447_v52 = vrot.slane %v445_v30, %v3221_v25 }
  0x5f   : > { %2969 = vset.pattern.permute.xlu1 %v3042_v9 }
  0x60   : > { %1074 = vperm.xlu1 %2969, %v1032_v53   ;;  %1406 = vperm.xlu0 %2974, %v1388_v54  }
  0x64   : > { %404 = vperm.xlu1 %2969, %v3189_v15   ;;  %1416 = vperm.xlu0 %2974, %v1390_v55  }
  0x68   : > { %409 = vperm.xlu1 %2969, %v347_v56   ;;  %1426 = vperm.xlu0 %2974, %v1392_v57  }
  0x6c   : > { %2970 = vset.pattern.permute.xlu1 %v3041_v2  ;;  %1956 = vperm.xlu0 %2974, %v1952_v58  }
  0x6d   : > { %679 = vperm.xlu1 %2970, %v347_v56  }
  0x70   : > { %2299 = vperm.xlu0 %2974, %v2296_v59  }
  0x71   : > { %2971 = vset.pattern.permute.xlu1 %v3042_v9 }
  0x72   : > { %1084 = vperm.xlu1 %2971, %v1034_v60  }
  0x76   : > { %414 = vperm.xlu1 %2971, %v3207_v21  }
  0x7a   : > { %419 = vperm.xlu1 %2971, %v349_v61  }
  0x7e   : > { %2972 = vset.pattern.permute.xlu1 %v3041_v2 }
  0x7f   : > { %687 = vperm.xlu1 %2972, %v349_v61  }
  0x83   : > { %2973 = vset.pattern.permute.xlu1 %v3042_v9 }
  0x84   : > { %1094 = vperm.xlu1 %2973, %v1036_v62  }
  0x88   : > { %424 = vperm.xlu1 %2973, %v3218_v24   ;;  %v1041_v24 = vld [vmem:[%s4762_s2 + $0x78] sm:$0xff] }
  0x8c   : > { %429 = vperm.xlu1 %2973, %v351_v63  }
  0x90   : > { %2975 = vset.pattern.permute.xlu1 %v3041_v2  ;;  %v441_v2 = vrot.slane %v334_v1, %v440_v22 }
  0x91   : > { %695 = vperm.xlu1 %2975, %v351_v63  }
  0x92   : > { %v3397_v32 = vrot.slane %v441_v2, %v3221_v25 }
  0x95   : > { %2976 = vset.pattern.permute.xlu1 %v3042_v9  ;;  %v709_v9 = vrot.slane %v334_v1, %v708_v14  ;;  %v1389_v1 = vld [vmem:[%s4764_s4 + $0x18] sm:$0xff] }
  0x96   : > { %1104 = vperm.xlu1 %2976, %v1038_v0   ;;  %v636_v3 = vpop.permute.xlu1 %635  ;;  %v644_v4 = vpop.permute.xlu0 %643 }
  0x97   : > { %v3362_v12 = vmul.f32 %v3212_v23, %v636_v3  ;;  %v3365_v15 = vmul.f32 %v3237_v31, %v636_v3  ;;  %v3368_v16 = vmul.f32 %v3242_v33, %v636_v3  ;;  %v3371_v13 = vmul.f32 %v3260_v40, %v636_v3 }
  0x98   : > { %v3374_v20 = vmul.f32 %v3212_v23, %v644_v4  ;;  %v3377_v14 = vmul.f32 %v3237_v31, %v644_v4  ;;  %v3380_v21 = vmul.f32 %v3242_v33, %v644_v4  ;;  %v3383_v22 = vmul.f32 %v3260_v40, %v644_v4 }
  0x99   : > { %4838 = vst [vmem:[#allocation11_spill] sm:$0xff] %v3368_v16  ;;  %4839 = vst [vmem:[#allocation12_spill] sm:$0xff] %v3371_v13  ;;  %v3406_v37 = vrot.slane %v709_v9, %v3198_v18  ;;  %v3438_v49 = vmul.f32 %v3389_v26, %v636_v3  ;;  %v3450_v53 = vmul.f32 %v3400_v35, %v636_v3 }
  0x9a   : > { %1114 = vperm.xlu1 %2976, %v1040_v5   ;;  %v640_v17 = vpop.permute.xlu1 %639  ;;  %v652_v19 = vpop.permute.xlu0 %651  ;;  %4840 = vst [vmem:[#allocation13_spill] sm:$0xff] %v3374_v20  ;;  %4841 = vst [vmem:[#allocation14_spill] sm:$0xff] %v3377_v14  ;;  %v3453_v54 = vmul.f32 %v3403_v36, %v636_v3  ;;  %v3459_v56 = vmul.f32 %v3389_v26, %v644_v4  ;;  %v3488_v5 = vmul.f32 %v3400_v35, %v644_v4 }
  0x9b   : > { %4842 = vst [vmem:[#allocation15_spill] sm:$0xff] %v3380_v21  ;;  %4843 = vst [vmem:[#allocation16_spill] sm:$0xff] %v3383_v22  ;;  %v3409_v39 = vmul.f32 %v3212_v23, %v640_v17  ;;  %v3412_v34 = vmul.f32 %v3237_v31, %v640_v17  ;;  %v3415_v8 = vmul.f32 %v3242_v33, %v640_v17  ;;  %v4770_v22 = vmov 0.0  }
  0x9c   : > { %4844 = vst [vmem:[#allocation17_spill] sm:$0xff] %v3406_v37  ;;  %v3418_v11 = vmul.f32 %v3260_v40, %v640_v17  ;;  %v3421_v43 = vmul.f32 %v3212_v23, %v652_v19  ;;  %v3424_v18 = vmul.f32 %v3237_v31, %v652_v19  ;;  %v3427_v44 = vmul.f32 %v3242_v33, %v652_v19 }
  0x9d   : > { %4845 = vst [vmem:[#allocation18_spill] sm:$0xff] %v3409_v39  ;;  %4846 = vst [vmem:[#allocation19_spill] sm:$0xff] %v3412_v34  ;;  %v3430_v46 = vmul.f32 %v3260_v40, %v652_v19  ;;  %v3456_v55 = vmul.f32 %v3406_v37, %v636_v3  ;;  %v3485_v3 = vmul.f32 %v3389_v26, %v640_v17  ;;  %1498 = vmatprep.mubr.f32.mxu0 %v4770_v22 }
  0x9e   : > { %4847 = vst [vmem:[#allocation20_spill] sm:$0xff] %v3415_v8  ;;  %4848 = vst [vmem:[#allocation21_spill] sm:$0xff] %v3418_v11  ;;  %1119 = vperm.xlu1 %2976, %v1041_v24   ;;  %v660_v42 = vpop.permute.xlu0 %659  ;;  %v3491_v6 = vmul.f32 %v3403_v36, %v644_v4  ;;  %v3494_v2 = vmul.f32 %v3406_v37, %v644_v4  ;;  %v3497_v10 = vmul.f32 %v3400_v35, %v640_v17 }
  0x9f   : > { %4849 = vst [vmem:[#allocation22_spill] sm:$0xff] %v3427_v44  ;;  %4850 = vst [vmem:[#allocation23_spill] sm:$0xff] %v3430_v46  ;;  %v3432_v47 = vpop.permute.xlu1 %369  ;;  %v3470_v61 = vmul.f32 %v3212_v23, %v660_v42  ;;  %v3473_v62 = vmul.f32 %v3237_v31, %v660_v42  ;;  %v3476_v63 = vmul.f32 %v3242_v33, %v660_v42  ;;  %1611 = vmatprep.mubr.f32.mxu1 %v4770_v22 }
  0xa0   : > { %v535_v57 = vmul.f32 %v3231_v29, %v3432_v47  ;;  %v537_v58 = vmul.f32 %v3256_v38, %v3432_v47  ;;  %v534_v25 = vmul.f32 %v3263_v41, %v3432_v47  ;;  %v536_v59 = vmul.f32 %v3275_v45, %v3432_v47 }
  0xa1   : > { %4851 = vst [vmem:[#allocation24_spill] sm:$0xff] %v3470_v61  ;;  %4852 = vst [vmem:[#allocation25_spill] sm:$0xff] %v3473_v62  ;;  %v3479_v0 = vmul.f32 %v3260_v40, %v660_v42  ;;  %v3500_v9 = vmul.f32 %v3403_v36, %v640_v17  ;;  %v3503_v24 = vmul.f32 %v3406_v37, %v640_v17  ;;  %v1391_v61 = vld [vmem:[%s4764_s4 + $0x28] sm:$0xff] }
  0xa2   : > { %1401 = vperm.xlu1 %2976, %v1387_v48   ;;  %v668_v60 = vpop.permute.xlu0 %667  ;;  %4853 = vst [vmem:[#allocation26_spill] sm:$0xff] %v3476_v63  ;;  %v3506_v27 = vmul.f32 %v3389_v26, %v652_v19  ;;  %v3509_v28 = vmul.f32 %v3400_v35, %v652_v19  ;;  %v3512_v30 = vmul.f32 %v3403_v36, %v652_v19 }
  0xa3   : > { %4854 = vst [vmem:[#allocation27_spill] sm:$0xff] %v3479_v0  ;;  %v3515_v4 = vmul.f32 %v3406_v37, %v652_v19  ;;  %v3518_v48 = vmul.f32 %v3389_v26, %v660_v42  ;;  %v531_v19 = vmul.f32 %v3397_v32, %v3432_v47  ;;  %v3531_v46 = vmul.f32 %v3400_v35, %v660_v42 }
  0xa4   : > { %v648_v7 = vpop.permute.xlu1 %647  ;;  %v3537_v44 = vmul.f32 %v3406_v37, %v660_v42  ;;  %v3557_v39 = vmul.f32 %v3212_v23, %v668_v60  ;;  %v3563_v22 = vmul.f32 %v3242_v33, %v668_v60 }
  0xa5   : > { %v799_v17 = vmul.f32 %v3212_v23, %v648_v7  ;;  %v801_v63 = vmul.f32 %v3237_v31, %v648_v7  ;;  %v798_v62 = vmul.f32 %v3242_v33, %v648_v7  ;;  %4856 = vst [vmem:[#allocation29_spill] sm:$0xff] %v3531_v46  ;;  %v795_v21 = vmul.f32 %v3389_v26, %v648_v7 }
  0xa6   : > { %1411 = vperm.xlu1 %2976, %v1389_v1   ;;  %v3520_v0 = vpop.permute.xlu0 %675  ;;  %v3534_v1 = vmul.f32 %v3403_v36, %v660_v42  ;;  %4858 = vst [vmem:[#allocation31_spill] sm:$0xff] %v3537_v44  ;;  %v797_v14 = vmul.f32 %v3400_v35, %v648_v7  ;;  %v794_v20 = vmul.f32 %v3403_v36, %v648_v7  ;;  %4864 = vst [vmem:[#allocation37_spill] sm:$0xff] %v3557_v39 }
  0xa7   : > { %4855 = vst [vmem:[#allocation28_spill] sm:$0xff] %v3520_v0  ;;  %v796_v11 = vmul.f32 %v3406_v37, %v648_v7  ;;  %v3547_v8 = vadd.f32 %v799_v17, %v535_v57  ;;  %v3549_v16 = vadd.f32 %v801_v63, %v537_v58  ;;  %v3551_v42 = vadd.f32 %v798_v62, %v534_v25  ;;  %v1393_v58 = vld [vmem:[%s4764_s4 + $0x38] sm:$0xff] }
  0xa8   : > { %4857 = vst [vmem:[#allocation30_spill] sm:$0xff] %v3534_v1  ;;  %v800_v34 = vmul.f32 %v3260_v40, %v648_v7  ;;  %v3560_v1 = vmul.f32 %v3237_v31, %v668_v60  ;;  %4866 = vst [vmem:[#allocation39_spill] sm:$0xff] %v3563_v22  ;;  %v3566_v57 = vmul.f32 %v3260_v40, %v668_v60 }
  0xa9   : > { %v3545_v13 = vpop.permute.xlu1 %1044  ;;  %4860 = vst [vmem:[#allocation33_spill] sm:$0xff] %v3547_v8  ;;  %4861 = vst [vmem:[#allocation34_spill] sm:$0xff] %v3549_v16  ;;  %v533_v25 = vmul.f32 %v3441_v50, %v3432_v47  ;;  %v532_v62 = vmul.f32 %v3447_v52, %v3432_v47  ;;  %v3578_v63 = vmul.f32 %v3389_v26, %v668_v60 }
  0xaa   : > { %4859 = vst [vmem:[#allocation32_spill] sm:$0xff] %v3545_v13  ;;  %4862 = vst [vmem:[#allocation35_spill] sm:$0xff] %v3551_v42  ;;  %1421 = vperm.xlu1 %2976, %v1391_v61   ;;  %v3554_v44 = vpop.permute.xlu0 %683  ;;  %v530_v61 = vmul.f32 %v3444_v51, %v3432_v47  ;;  %v3581_v7 = vmul.f32 %v3400_v35, %v668_v60  ;;  %v3584_v17 = vmul.f32 %v3403_v36, %v668_v60 }
  0xab   : > { %4863 = vst [vmem:[#allocation36_spill] sm:$0xff] %v3554_v44  ;;  %4865 = vst [vmem:[#allocation38_spill] sm:$0xff] %v3560_v1  ;;  %v3589_v22 = vadd.f32 %v800_v34, %v536_v59  ;;  %v3591_v39 = vadd.f32 %v795_v21, %v531_v19  ;;  %v3593_v40 = vadd.f32 %v797_v14, %v533_v25  ;;  %v1953_v14 = vld [vmem:[%s4766_s6 + $0x8] sm:$0xff] }
  0xac   : > { %4867 = vst [vmem:[#allocation40_spill] sm:$0xff] %v3566_v57  ;;  %4868 = vst [vmem:[#allocation41_spill] sm:$0xff] %v3578_v63  ;;  %v3587_v57 = vmul.f32 %v3406_v37, %v668_v60  ;;  %v3595_v47 = vadd.f32 %v794_v20, %v530_v61  ;;  %v3597_v33 = vadd.f32 %v796_v11, %v532_v62 }
  0xad   : > { %4869 = vst [vmem:[#allocation42_spill] sm:$0xff] %v3581_v7  ;;  %4870 = vst [vmem:[#allocation43_spill] sm:$0xff] %v3584_v17  ;;  %v375_v1 = vpop.permute.xlu1 %374  ;;  %v3603_v23 = vmul.f32 %v3389_v26, %v3520_v0  ;;  %v3607_v34 = vmul.f32 %v3400_v35, %v3520_v0  ;;  %v3611_v21 = vmul.f32 %v3403_v36, %v3520_v0 }
  0xae   : > { %4871 = vst [vmem:[#allocation44_spill] sm:$0xff] %v3587_v57  ;;  %4872 = vst [vmem:[#allocation45_spill] sm:$0xff] %v3589_v22  ;;  %1431 = vperm.xlu1 %2976, %v1393_v58   ;;  %v3599_v31 = vpop.permute.xlu0 %691  ;;  %v3615_v20 = vmul.f32 %v3406_v37, %v3520_v0  ;;  %v539_v11 = vmul.f32 %v3397_v32, %v375_v1  ;;  %v541_v59 = vmul.f32 %v3441_v50, %v375_v1 }
  0xaf   : > { %4873 = vst [vmem:[#allocation46_spill] sm:$0xff] %v3599_v31  ;;  %4874 = vst [vmem:[#allocation47_spill] sm:$0xff] %v3603_v23  ;;  %v3624_v60 = vmul.f32 %v3389_v26, %v3554_v44  ;;  %v3628_v19 = vmul.f32 %v3400_v35, %v3554_v44  ;;  %v3631_v58 = vmul.f32 %v3444_v51, %v375_v1 }
  0xb0   : > { %4875 = vst [vmem:[#allocation48_spill] sm:$0xff] %v3607_v34  ;;  %4876 = vst [vmem:[#allocation49_spill] sm:$0xff] %v3611_v21  ;;  %v3634_v25 = vmul.f32 %v3447_v52, %v375_v1  ;;  %v3638_v61 = vmul.f32 %v3403_v36, %v3554_v44  ;;  %v3642_v62 = vmul.f32 %v3406_v37, %v3554_v44 }
  0xb1   : > { %4877 = vst [vmem:[#allocation50_spill] sm:$0xff] %v3615_v20  ;;  %4878 = vst [vmem:[#allocation51_spill] sm:$0xff] %v3624_v60  ;;  %v3644_v0 = vpop.permute.xlu1 %379  ;;  %v543_v60 = vmul.f32 %v3231_v29, %v375_v1  ;;  %v3649_v22 = vmul.f32 %v3263_v41, %v375_v1  ;;  %v3652_v20 = vmul.f32 %v3275_v45, %v375_v1 }
  0xb2   : > { %4879 = vst [vmem:[#allocation52_spill] sm:$0xff] %v3628_v19  ;;  %4880 = vst [vmem:[#allocation53_spill] sm:$0xff] %v3638_v61  ;;  %v545_v19 = vmul.f32 %v3256_v38, %v375_v1  ;;  %1961 = vperm.xlu1 %2976, %v1953_v14   ;;  %v3656_v61 = vmul.f32 %v3389_v26, %v3599_v31  ;;  %v3660_v44 = vmul.f32 %v3400_v35, %v3599_v31 }
  0xb3   : > { %4881 = vst [vmem:[#allocation54_spill] sm:$0xff] %v3642_v62  ;;  %4882 = vst [vmem:[#allocation55_spill] sm:$0xff] %v3649_v22  ;;  %v3664_v62 = vmul.f32 %v3403_v36, %v3599_v31  ;;  %v3668_v42 = vmul.f32 %v3406_v37, %v3599_v31  ;;  %v355_v22 = vpop.permute.xlu0 %354  ;;  %v3671_v1 = vadd.f32 %v3506_v27, %v539_v11 }
  0xb4   : > { %4883 = vst [vmem:[#allocation56_spill] sm:$0xff] %v3652_v20  ;;  %4884 = vst [vmem:[#allocation57_spill] sm:$0xff] %v3656_v61  ;;  %v3674_v14 = vadd.f32 %v3509_v28, %v541_v59  ;;  %v3677_v61 = vadd.f32 %v3421_v43, %v543_v60  ;;  %v507_v20 = vmul.f32 %v3397_v32, %v355_v22 }
  0xb5   : > { %4885 = vst [vmem:[#allocation58_spill] sm:$0xff] %v3660_v44  ;;  %4886 = vst [vmem:[#allocation59_spill] sm:$0xff] %v3664_v62  ;;  %v3680_v44 = vadd.f32 %v3424_v18, %v545_v19  ;;  %v509_v62 = vmul.f32 %v3441_v50, %v355_v22  ;;  %v506_v31 = vmul.f32 %v3444_v51, %v355_v22 }
  0xb6   : > { %4887 = vst [vmem:[#allocation60_spill] sm:$0xff] %v3668_v42  ;;  %4888 = vst [vmem:[#allocation61_spill] sm:$0xff] %v3677_v61  ;;  %v508_v42 = vmul.f32 %v3447_v52, %v355_v22  ;;  %v511_v27 = vmul.f32 %v3231_v29, %v355_v22  ;;  %v513_v11 = vmul.f32 %v3256_v38, %v355_v22  ;;  %v3694_v18 = vpop.permute.xlu1 %655 }
  0xb7   : > { %4889 = vst [vmem:[#allocation62_spill] sm:$0xff] %v3680_v44  ;;  %v3689_v28 = vmul.f32 %v3263_v41, %v355_v22  ;;  %v3692_v43 = vmul.f32 %v3275_v45, %v355_v22  ;;  %4892 = vst [vmem:[#allocation65_spill] sm:$0xff] %v3694_v18  ;;  %v899_v59 = vadd.f32 %v3438_v49, %v507_v20  ;;  %v3700_v61 = vpop.permute.xlu0 %359 }
  0xb8   : > { %v901_v60 = vadd.f32 %v3450_v53, %v509_v62  ;;  %v898_v19 = vadd.f32 %v3453_v54, %v506_v31  ;;  %v900_v44 = vadd.f32 %v3456_v55, %v508_v42  ;;  %4893 = vst [vmem:[#allocation66_spill] sm:$0xff] %v3700_v61  ;;  %v547_v16 = vmul.f32 %v3397_v32, %v3644_v0 }
  0xb9   : > { %4890 = vst [vmem:[#allocation63_spill] sm:$0xff] %v3689_v28  ;;  %4891 = vst [vmem:[#allocation64_spill] sm:$0xff] %v3692_v43  ;;  %v549_v8 = vmul.f32 %v3441_v50, %v3644_v0  ;;  %v546_v22 = vmul.f32 %v3444_v51, %v3644_v0  ;;  %v548_v49 = vmul.f32 %v3447_v52, %v3644_v0 }
  0xba   : > { %v515_v53 = vmul.f32 %v3397_v32, %v3700_v61  ;;  %v1123_v31 = vadd.f32 %v3545_v13, %v899_v59  ;;  %v517_v54 = vmul.f32 %v3441_v50, %v3700_v61  ;;  %v1125_v55 = vadd.f32 %v3545_v13, %v901_v60 }
  0xbb   : > { %v514_v42 = vmul.f32 %v3444_v51, %v3700_v61  ;;  %v1122_v20 = vadd.f32 %v3545_v13, %v898_v19  ;;  %v516_v62 = vmul.f32 %v3447_v52, %v3700_v61  ;;  %v1124_v21 = vadd.f32 %v3545_v13, %v900_v44  ;;  %v3730_v57 = vpop.permute.xlu0 %364  ;;  %v3732_v19 = vpop.permute.xlu1 %1054 }
  0xbc   : > { %v811_v34 = vmul.f32 %v3389_v26, %v3694_v18  ;;  %v813_v59 = vmul.f32 %v3400_v35, %v3694_v18  ;;  %v810_v23 = vmul.f32 %v3403_v36, %v3694_v18  ;;  %v812_v60 = vmul.f32 %v3406_v37, %v3694_v18  ;;  %4894 = vst [vmem:[#allocation67_spill] sm:$0xff] %v3730_v57 }
  0xbd   : > { %v907_v17 = vadd.f32 %v3485_v3, %v515_v53  ;;  %v1251_v43 = vmax.f32 %v1123_v31, 0.0  ;;  %v909_v44 = vadd.f32 %v3497_v10, %v517_v54  ;;  %v1253_v45 = vmax.f32 %v1125_v55, 0.0 }
  0xbe   : > { %v523_v28 = vmul.f32 %v3397_v32, %v3730_v57  ;;  %v525_v41 = vmul.f32 %v3441_v50, %v3730_v57  ;;  %v522_v13 = vmul.f32 %v3444_v51, %v3730_v57  ;;  %v524_v18 = vmul.f32 %v3447_v52, %v3730_v57 }
  0xbf   : > { %v906_v7 = vadd.f32 %v3500_v9, %v514_v42  ;;  %v1250_v63 = vmax.f32 %v1122_v20, 0.0  ;;  %v908_v3 = vadd.f32 %v3503_v24, %v516_v62  ;;  %v1252_v53 = vmax.f32 %v1124_v21, 0.0  ;;  %v3750_v37 = vpop.permute.xlu0 %1049  ;;  %v3752_v46 = vpop.permute.xlu1 %384 }
  0xc0   : > { %v915_v10 = vadd.f32 %v3459_v56, %v523_v28  ;;  %v917_v31 = vadd.f32 %v3488_v5, %v525_v41  ;;  %v914_v54 = vadd.f32 %v3491_v6, %v522_v13  ;;  %v916_v55 = vadd.f32 %v3494_v2, %v524_v18 }
  0xc1   : > { %v3756_v57 = vmul.f32 %v3231_v29, %v3700_v61  ;;  %v3759_v9 = vadd.f32 %v3362_v12, %v511_v27  ;;  %v3763_v56 = vmul.f32 %v3256_v38, %v3700_v61  ;;  %v3766_v41 = vadd.f32 %v3365_v15, %v513_v11 }
  0xc2   : > { %v1131_v13 = vadd.f32 %v3750_v37, %v907_v17  ;;  %v1133_v5 = vadd.f32 %v3750_v37, %v909_v44  ;;  %v1130_v6 = vadd.f32 %v3750_v37, %v906_v7  ;;  %v1132_v2 = vadd.f32 %v3750_v37, %v908_v3 }
  0xc3   : > { %v1139_v24 = vadd.f32 %v3732_v19, %v915_v10  ;;  %v1141_v12 = vadd.f32 %v3732_v19, %v917_v31  ;;  %v1138_v21 = vadd.f32 %v3732_v19, %v914_v54  ;;  %v1140_v27 = vadd.f32 %v3732_v19, %v916_v55  ;;  %v3776_v42 = vpop.permute.xlu0 %1059  ;;  %v3778_v17 = vpop.permute.xlu1 %389 }
  0xc4   : > { %v1259_v28 = vmax.f32 %v1131_v13, 0.0  ;;  %v1261_v18 = vmax.f32 %v1133_v5, 0.0  ;;  %v1258_v15 = vmax.f32 %v1130_v6, 0.0  ;;  %v1260_v11 = vmax.f32 %v1132_v2, 0.0  ;;  %4895 = vst [vmem:[#allocation68_spill] sm:$0xff] %v3778_v17 }
  0xc5   : > { %v939_v20 = vadd.f32 %v811_v34, %v547_v16  ;;  %v941_v7 = vadd.f32 %v813_v59, %v549_v8  ;;  %v938_v62 = vadd.f32 %v810_v23, %v546_v22  ;;  %v940_v44 = vadd.f32 %v812_v60, %v548_v49 }
  0xc6   : > { %v2709_v3 = vpack.c.bf16 %v1259_v28, %v1251_v43  ;;  %v2741_v10 = vpack.c.bf16 %v1261_v18, %v1253_v45  ;;  %v2711_v61 = vpack.c.bf16 %v1258_v15, %v1250_v63  ;;  %v2743_v31 = vpack.c.bf16 %v1260_v11, %v1252_v53 }
  0xc7   : > { %v1147_v54 = vadd.f32 %v3776_v42, %v3591_v39  ;;  %v1149_v55 = vadd.f32 %v3776_v42, %v3593_v40  ;;  %v1146_v13 = vadd.f32 %v3776_v42, %v3595_v47  ;;  %v1148_v5 = vadd.f32 %v3776_v42, %v3597_v33  ;;  %v3788_v63 = vpop.permute.xlu0 %1069 }
  0xc8   : > { %2710 = vmatprep.subr.bf16.mxu0 %v2709_v3  ;;  %2742 = vmatprep.subr.bf16.mxu1 %v2741_v10  ;;  %v1267_v23 = vmax.f32 %v1139_v24, 0.0  ;;  %v1269_v16 = vmax.f32 %v1141_v12, 0.0  ;;  %v1266_v8 = vmax.f32 %v1138_v21, 0.0  ;;  %v1268_v45 = vmax.f32 %v1140_v27, 0.0  ;;  %v3790_v22 = vpop.permute.xlu1 %663 }
  0xc9   : > { %2712 = vmatpush1.bf16.msra.mxu0 %v2711_v61  ;;  %2744 = vmatpush1.bf16.msra.mxu1 %v2743_v31  ;;  %v1275_v39 = vmax.f32 %v1147_v54, 0.0  ;;  %v1277_v34 = vmax.f32 %v1149_v55, 0.0  ;;  %v1274_v43 = vmax.f32 %v1146_v13, 0.0  ;;  %v1276_v40 = vmax.f32 %v1148_v5, 0.0  ;;  %4896 = vst [vmem:[#allocation69_spill] sm:$0xff] %v3790_v22 }
  0xca   : > { %v1163_v47 = vadd.f32 %v3788_v63, %v939_v20  ;;  %v1165_v33 = vadd.f32 %v3788_v63, %v941_v7  ;;  %v1162_v49 = vadd.f32 %v3788_v63, %v938_v62  ;;  %v1164_v59 = vadd.f32 %v3788_v63, %v940_v44 }
  0xcb   : > { %v2713_v60 = vpack.c.bf16 %v1275_v39, %v1267_v23  ;;  %v2745_v53 = vpack.c.bf16 %v1277_v34, %v1269_v16  ;;  %v2715_v6 = vpack.c.bf16 %v1274_v43, %v1266_v8  ;;  %v2747_v2 = vpack.c.bf16 %v1276_v40, %v1268_v45 }
  0xcc   : > { %v930_v61 = vadd.f32 %v3512_v30, %v3631_v58  ;;  %v932_v24 = vadd.f32 %v3515_v4, %v3634_v25  ;;  %v555_v12 = vmul.f32 %v3397_v32, %v3752_v46  ;;  %v3804_v21 = vmul.f32 %v3231_v29, %v3644_v0  ;;  %v3812_v4 = vpop.permute.xlu0 %1079 }
  0xcd   : > { %2714 = vmatprep.subr.bf16.mxu0 %v2713_v60  ;;  %2746 = vmatprep.subr.bf16.mxu1 %v2745_v53  ;;  %v1291_v27 = vmax.f32 %v1163_v47, 0.0  ;;  %v563_v28 = vmul.f32 %v3397_v32, %v3778_v17  ;;  %v827_v18 = vmul.f32 %v3389_v26, %v3790_v22  ;;  %v557_v30 = vmul.f32 %v3441_v50, %v3752_v46  ;;  %v3816_v20 = vpop.permute.xlu1 %1064 }
  0xce   : > { %2716 = vmatpush1.bf16.msra.mxu0 %v2715_v6  ;;  %2748 = vmatpush1.bf16.msra.mxu1 %v2747_v2  ;;  %4897 = vst [vmem:[#allocation70_spill] sm:$0xff] %v3812_v4  ;;  %v1293_v58 = vmax.f32 %v1165_v33, 0.0  ;;  %v1290_v25 = vmax.f32 %v1162_v49, 0.0  ;;  %v1292_v15 = vmax.f32 %v1164_v59, 0.0  ;;  %v829_v11 = vmul.f32 %v3400_v35, %v3790_v22  ;;  %v4899_v6 = vld [vmem:[#allocation29_spill] sm:$0xff] }
  0xcf   : > { %v955_v7 = vadd.f32 %v827_v18, %v563_v28  ;;  %v565_v62 = vmul.f32 %v3441_v50, %v3778_v17  ;;  %v562_v44 = vmul.f32 %v3444_v51, %v3778_v17  ;;  %v826_v3 = vmul.f32 %v3403_v36, %v3790_v22 }
  0xd0   : > { %v1155_v10 = vadd.f32 %v3816_v20, %v3671_v1  ;;  %v1157_v31 = vadd.f32 %v3816_v20, %v3674_v14  ;;  %v1154_v54 = vadd.f32 %v3816_v20, %v930_v61  ;;  %v1156_v55 = vadd.f32 %v3816_v20, %v932_v24  ;;  %v4900_v24 = vld [vmem:[#allocation17_spill] sm:$0xff] }
  0xd1   : > { %v3831_v13 = vadd.f32 %v3812_v4, %v955_v7  ;;  %v957_v5 = vadd.f32 %v829_v11, %v565_v62  ;;  %v554_v23 = vmul.f32 %v3444_v51, %v3752_v46  ;;  %v954_v16 = vadd.f32 %v826_v3, %v562_v44  ;;  %v3835_v1 = vpop.permute.xlu1 %394  ;;  %v4901_v11 = vld [vmem:[#allocation30_spill] sm:$0xff]  ;;  %v4904_v44 = vld [vmem:[#allocation31_spill] sm:$0xff] }
  0xd2   : > { %v1283_v8 = vmax.f32 %v1155_v10, 0.0  ;;  %v1285_v45 = vmax.f32 %v1157_v31, 0.0  ;;  %v1282_v39 = vmax.f32 %v1154_v54, 0.0  ;;  %v1284_v34 = vmax.f32 %v1156_v55, 0.0  ;;  %4898 = vst [vmem:[#allocation71_spill] sm:$0xff] %v3835_v1 }
  0xd3   : > { %v3838_v14 = vadd.f32 %v3812_v4, %v957_v5  ;;  %v3841_v43 = vadd.f32 %v3812_v4, %v954_v16  ;;  %v556_v40 = vmul.f32 %v3447_v52, %v3752_v46  ;;  %v3847_v47 = vmul.f32 %v3256_v38, %v3644_v0  ;;  %v4905_v5 = vld [vmem:[#allocation41_spill] sm:$0xff] }
  0xd4   : > { %v2717_v33 = vpack.c.bf16 %v1291_v27, %v1283_v8  ;;  %v2749_v49 = vpack.c.bf16 %v1293_v58, %v1285_v45  ;;  %v2719_v59 = vpack.c.bf16 %v1290_v25, %v1282_v39  ;;  %v2751_v60 = vpack.c.bf16 %v1292_v15, %v1284_v34  ;;  %v4903_v15 = vld [vmem:[#allocation18_spill] sm:$0xff]  ;;  %v4907_v39 = vld [vmem:[#allocation32_spill] sm:$0xff] }
  0xd5   : > { %v947_v53 = vadd.f32 %v3518_v48, %v555_v12  ;;  %v949_v2 = vadd.f32 %v4899_v6, %v557_v30  ;;  %v564_v61 = vmul.f32 %v3447_v52, %v3778_v17  ;;  %v828_v28 = vmul.f32 %v4900_v24, %v3790_v22  ;;  %v3861_v12 = vpop.permute.xlu1 %399  ;;  %v4909_v6 = vld [vmem:[#allocation66_spill] sm:$0xff]  ;;  %v4918_v17 = vld [vmem:[#allocation64_spill] sm:$0xff] }
  0xd6   : > { %2718 = vmatprep.subr.bf16.mxu0 %v2717_v33  ;;  %2750 = vmatprep.subr.bf16.mxu1 %v2749_v49  ;;  %v946_v7 = vadd.f32 %v4901_v11, %v554_v23  ;;  %v571_v27 = vmul.f32 %v3397_v32, %v3835_v1  ;;  %v573_v48 = vmul.f32 %v3441_v50, %v3835_v1  ;;  %v4908_v33 = vld [vmem:[#allocation19_spill] sm:$0xff] }
  0xd7   : > { %4902 = vst [vmem:[#allocation29_spill] sm:$0xff] %v3861_v12  ;;  %2720 = vmatpush1.bf16.msra.mxu0 %v2719_v59  ;;  %2752 = vmatpush1.bf16.msra.mxu1 %v2751_v60  ;;  %v956_v25 = vadd.f32 %v828_v28, %v564_v61  ;;  %v911_v62 = vadd.f32 %v4903_v15, %v3756_v57  ;;  %v4906_v57 = vld [vmem:[#allocation42_spill] sm:$0xff]  ;;  %v4910_v61 = vld [vmem:[#allocation9_spill] sm:$0xff]  ;;  %v4911_v11 = vld [vmem:[#allocation63_spill] sm:$0xff] }
  0xd8   : > { %v948_v3 = vadd.f32 %v4904_v44, %v556_v40  ;;  %v579_v10 = vmul.f32 %v3397_v32, %v3861_v12  ;;  %v570_v31 = vmul.f32 %v3444_v51, %v3835_v1  ;;  %v572_v54 = vmul.f32 %v3447_v52, %v3835_v1 }
  0xd9   : > { %v1180_v55 = vadd.f32 %v3812_v4, %v956_v25  ;;  %v3876_v23 = vadd.f32 %v4905_v5, %v571_v27  ;;  %v581_v16 = vmul.f32 %v3441_v50, %v3861_v12  ;;  %v3881_v8 = vadd.f32 %v4906_v57, %v573_v48  ;;  %v4912_v27 = vld [vmem:[#allocation11_spill] sm:$0xff] }
  0xda   : > { %v578_v45 = vmul.f32 %v3444_v51, %v3861_v12  ;;  %v1127_v34 = vadd.f32 %v4907_v39, %v3759_v9  ;;  %v1135_v40 = vadd.f32 %v3750_v37, %v911_v62  ;;  %v913_v49 = vadd.f32 %v4908_v33, %v3763_v56  ;;  %v3898_v25 = vpop.permute.xlu1 %671  ;;  %v4914_v56 = vld [vmem:[#allocation10_spill] sm:$0xff] }
  0xdb   : > { %v580_v59 = vmul.f32 %v3447_v52, %v3861_v12  ;;  %v1129_v60 = vadd.f32 %v4907_v39, %v3766_v41  ;;  %v518_v28 = vmul.f32 %v4910_v61, %v4909_v6  ;;  %v902_v48 = vadd.f32 %v4912_v27, %v4911_v11  ;;  %4913 = vst [vmem:[#allocation17_spill] sm:$0xff] %v3898_v25  ;;  %v3914_v12 = vpop.permute.xlu0 %1089 }
  0xdc   : > { %v1255_v9 = vmax.f32 %v1127_v34, 0.0  ;;  %v1263_v15 = vmax.f32 %v1135_v40, 0.0  ;;  %v1137_v62 = vadd.f32 %v3750_v37, %v913_v49  ;;  %v520_v44 = vmul.f32 %v4914_v56, %v4909_v6  ;;  %v4916_v49 = vld [vmem:[#allocation20_spill] sm:$0xff] }
  0xdd   : > { %v843_v5 = vmul.f32 %v3389_v26, %v3898_v25  ;;  %v845_v41 = vmul.f32 %v3400_v35, %v3898_v25  ;;  %v842_v57 = vmul.f32 %v3403_v36, %v3898_v25  ;;  %v844_v33 = vmul.f32 %v4900_v24, %v3898_v25  ;;  %v4919_v25 = vld [vmem:[#allocation12_spill] sm:$0xff] }
  0xde   : > { %v3911_v11 = vpack.c.bf16 %v1263_v15, %v1255_v9  ;;  %v1257_v34 = vmax.f32 %v1129_v60, 0.0  ;;  %v1265_v40 = vmax.f32 %v1137_v62, 0.0  ;;  %v910_v27 = vadd.f32 %v4916_v49, %v518_v28 }
  0xdf   : > { %v971_v58 = vadd.f32 %v843_v5, %v579_v10  ;;  %v973_v6 = vadd.f32 %v845_v41, %v581_v16  ;;  %v970_v30 = vadd.f32 %v842_v57, %v578_v45  ;;  %v972_v18 = vadd.f32 %v844_v33, %v580_v59  ;;  %v3922_v15 = vpop.permute.xlu1 %1074  ;;  %v4920_v10 = vld [vmem:[#allocation43_spill] sm:$0xff]  ;;  %v4921_v45 = vld [vmem:[#allocation44_spill] sm:$0xff] }
  0xe0   : > { %4915 = vst [vmem:[#allocation30_spill] sm:$0xff] %v3911_v11  ;;  %v3916_v1 = vpack.c.bf16 %v1265_v40, %v1257_v34  ;;  %v1126_v4 = vadd.f32 %v4907_v39, %v902_v48  ;;  %v1134_v22 = vadd.f32 %v3750_v37, %v910_v27  ;;  %v904_v9 = vadd.f32 %v4919_v25, %v4918_v17 }
  0xe1   : > { %v1308_v60 = vmax.f32 %v1180_v55, 0.0  ;;  %v3925_v28 = vadd.f32 %v3914_v12, %v971_v58  ;;  %v3928_v16 = vadd.f32 %v4920_v10, %v570_v31  ;;  %v3931_v59 = vadd.f32 %v4921_v45, %v572_v54 }
  0xe2   : > { %4917 = vst [vmem:[#allocation18_spill] sm:$0xff] %v3916_v1  ;;  %v1171_v62 = vadd.f32 %v3922_v15, %v947_v53  ;;  %v1173_v48 = vadd.f32 %v3922_v15, %v949_v2  ;;  %v1170_v5 = vadd.f32 %v3922_v15, %v946_v7  ;;  %v1172_v17 = vadd.f32 %v3922_v15, %v948_v3  ;;  %v4923_v3 = vld [vmem:[#allocation21_spill] sm:$0xff] }
  0xe3   : > { %v3939_v55 = vadd.f32 %v3914_v12, %v973_v6  ;;  %v3942_v58 = vadd.f32 %v3914_v12, %v970_v30  ;;  %v3945_v31 = vadd.f32 %v3914_v12, %v972_v18  ;;  %v3947_v2 = vpop.permute.xlu1 %404  ;;  %v1254_v7 = vmax.f32 %v1126_v4, 0.0 }
  0xe4   : > { %v1299_v54 = vmax.f32 %v1171_v62, 0.0  ;;  %v1301_v41 = vmax.f32 %v1173_v48, 0.0  ;;  %v1298_v53 = vmax.f32 %v1170_v5, 0.0  ;;  %v1300_v57 = vmax.f32 %v1172_v17, 0.0  ;;  %4922 = vst [vmem:[#allocation31_spill] sm:$0xff] %v3947_v2  ;;  %v4930_v5 = vld [vmem:[#allocation47_spill] sm:$0xff] }
  0xe5   : > { %v1262_v33 = vmax.f32 %v1134_v22, 0.0  ;;  %v912_v34 = vadd.f32 %v4923_v3, %v520_v44  ;;  %v1128_v40 = vadd.f32 %v4907_v39, %v904_v9  ;;  %v4924_v49 = vmax.f32 %v3831_v13, 0.0  ;;  %v4928_v44 = vld [vmem:[#allocation67_spill] sm:$0xff]  ;;  %v4940_v48 = vld [vmem:[#allocation14_spill] sm:$0xff] }
  0xe6   : > { %v4925_v30 = vmax.f32 %v3838_v14, 0.0  ;;  %v4926_v18 = vmax.f32 %v3841_v43, 0.0  ;;  %v2755_v45 = vpack.c.bf16 %v1308_v60, %v1300_v57  ;;  %v587_v4 = vmul.f32 %v3397_v32, %v3947_v2  ;;  %v4931_v57 = vld [vmem:[#allocation48_spill] sm:$0xff]  ;;  %v4941_v62 = vld [vmem:[#allocation15_spill] sm:$0xff] }
  0xe7   : > { %v2721_v27 = vpack.c.bf16 %v4924_v49, %v1299_v54  ;;  %v589_v22 = vmul.f32 %v3441_v50, %v3947_v2  ;;  %v586_v39 = vmul.f32 %v3444_v51, %v3947_v2  ;;  %v3965_v14 = vpack.c.bf16 %v1262_v33, %v1254_v7  ;;  %v3970_v60 = vpop.permute.xlu1 %409  ;;  %v4932_v33 = vld [vmem:[#allocation49_spill] sm:$0xff] }
  0xe8   : > { %v2753_v6 = vpack.c.bf16 %v4925_v30, %v1301_v41  ;;  %v2723_v10 = vpack.c.bf16 %v4926_v18, %v1298_v53  ;;  %v1136_v43 = vadd.f32 %v3750_v37, %v912_v34  ;;  %v527_v9 = vmul.f32 %v3231_v29, %v4928_v44  ;;  %4929 = vst [vmem:[#allocation42_spill] sm:$0xff] %v3970_v60 }
  0xe9   : > { %2722 = vmatprep.subr.bf16.mxu0 %v2721_v27  ;;  %4927 = vst [vmem:[#allocation41_spill] sm:$0xff] %v3965_v14  ;;  %v3974_v17 = vadd.f32 %v4930_v5, %v587_v4  ;;  %v588_v54 = vmul.f32 %v3447_v52, %v3947_v2  ;;  %v1256_v41 = vmax.f32 %v1128_v40, 0.0  ;;  %v595_v53 = vmul.f32 %v3397_v32, %v3970_v60  ;;  %v4933_v27 = vld [vmem:[#allocation13_spill] sm:$0xff]  ;;  %v4026_v2 = vpop.permute.xlu0 %1099 }
  0xea   : > { %2754 = vmatprep.subr.bf16.mxu1 %v2753_v6  ;;  %2724 = vmatpush1.bf16.msra.mxu0 %v2723_v10  ;;  %v597_v37 = vmul.f32 %v3441_v50, %v3970_v60  ;;  %v3983_v7 = vadd.f32 %v4931_v57, %v589_v22  ;;  %v3986_v3 = vadd.f32 %v4932_v33, %v586_v39  ;;  %v1264_v49 = vmax.f32 %v1136_v43, 0.0  ;;  %v4934_v6 = vld [vmem:[#allocation33_spill] sm:$0xff]  ;;  %v4935_v10 = vld [vmem:[#allocation34_spill] sm:$0xff]  ;;  %v4936_v22 = vld [vmem:[#allocation35_spill] sm:$0xff] }
  0xeb   : > { %2756 = vmatpush1.bf16.msra.mxu1 %v2755_v45  ;;  %v594_v34 = vmul.f32 %v3444_v51, %v3970_v60  ;;  %v919_v30 = vadd.f32 %v4933_v27, %v527_v9  ;;  %v1151_v40 = vadd.f32 %v3776_v42, %v4934_v6  ;;  %v529_v18 = vmul.f32 %v3256_v38, %v4928_v44  ;;  %v4939_v27 = vld [vmem:[#allocation50_spill] sm:$0xff] }
  0xec   : > { %v1153_v45 = vadd.f32 %v3776_v42, %v4935_v10  ;;  %v526_v4 = vmul.f32 %v4910_v61, %v4928_v44  ;;  %v1150_v39 = vadd.f32 %v3776_v42, %v4936_v22  ;;  %v596_v43 = vmul.f32 %v3447_v52, %v3970_v60  ;;  %v4008_v33 = vpop.permute.xlu1 %679  ;;  %4943 = vst [vmem:[#allocation66_spill] sm:$0xff] %v4026_v2 }
  0xed   : > { %v4003_v5 = vpack.c.bf16 %v1264_v49, %v1256_v41  ;;  %v1143_v9 = vadd.f32 %v3732_v19, %v919_v30  ;;  %v528_v57 = vmul.f32 %v4914_v56, %v4928_v44  ;;  %4938 = vst [vmem:[#allocation19_spill] sm:$0xff] %v4008_v33  ;;  %v4011_v6 = vadd.f32 %v4939_v27, %v588_v54 }
  0xee   : > { %v1279_v10 = vmax.f32 %v1151_v40, 0.0  ;;  %v921_v13 = vadd.f32 %v4940_v48, %v529_v18  ;;  %v918_v22 = vadd.f32 %v4941_v62, %v526_v4  ;;  %v859_v25 = vmul.f32 %v3389_v26, %v4008_v33  ;;  %v4942_v48 = vld [vmem:[#allocation16_spill] sm:$0xff] }
  0xef   : > { %4937 = vst [vmem:[#allocation32_spill] sm:$0xff] %v4003_v5  ;;  %v861_v41 = vmul.f32 %v3400_v35, %v4008_v33  ;;  %v858_v49 = vmul.f32 %v3403_v36, %v4008_v33  ;;  %v860_v44 = vmul.f32 %v4900_v24, %v4008_v33  ;;  %v1271_v30 = vmax.f32 %v1143_v9, 0.0 }
  0xf0   : > { %v1145_v54 = vadd.f32 %v3732_v19, %v921_v13  ;;  %v1142_v40 = vadd.f32 %v3732_v19, %v918_v22  ;;  %v920_v18 = vadd.f32 %v4942_v48, %v528_v57  ;;  %v987_v62 = vadd.f32 %v859_v25, %v595_v53 }
  0xf1   : > { %v989_v4 = vadd.f32 %v861_v41, %v597_v37  ;;  %v986_v27 = vadd.f32 %v858_v49, %v594_v34  ;;  %v988_v60 = vadd.f32 %v860_v44, %v596_v43  ;;  %v4028_v5 = vpack.c.bf16 %v1279_v10, %v1271_v30  ;;  %v4031_v33 = vpop.permute.xlu1 %1084 }
  0xf2   : > { %v1281_v14 = vmax.f32 %v1153_v45, 0.0  ;;  %v1278_v1 = vmax.f32 %v1150_v39, 0.0  ;;  %v1144_v11 = vadd.f32 %v3732_v19, %v920_v18  ;;  %v4034_v13 = vadd.f32 %v4026_v2, %v987_v62  ;;  %v4969_v39 = vld [vmem:[#allocation23_spill] sm:$0xff] }
  0xf3   : > { %4944 = vst [vmem:[#allocation9_spill] sm:$0xff] %v4028_v5  ;;  %v4037_v9 = vadd.f32 %v4026_v2, %v989_v4  ;;  %v4040_v25 = vadd.f32 %v4026_v2, %v986_v27  ;;  %v1273_v53 = vmax.f32 %v1145_v54, 0.0  ;;  %v1187_v37 = vadd.f32 %v4031_v33, %v3876_v23  ;;  %v4970_v5 = vld [vmem:[#allocation8_spill] sm:$0xff] }
  0xf4   : > { %v1189_v34 = vadd.f32 %v4031_v33, %v3881_v8  ;;  %v1186_v19 = vadd.f32 %v4031_v33, %v3928_v16  ;;  %v1188_v45 = vadd.f32 %v4031_v33, %v3931_v59  ;;  %v4053_v57 = vadd.f32 %v4026_v2, %v988_v60  ;;  %v4948_v59 = vld [vmem:[#allocation45_spill] sm:$0xff]  ;;  %v4139_v2 = vpop.permute.xlu0 %1109 }
  0xf5   : > { %v1270_v10 = vmax.f32 %v1142_v40, 0.0  ;;  %v1315_v22 = vmax.f32 %v1187_v37, 0.0  ;;  %v4055_v44 = vpop.permute.xlu1 %414  ;;  %v4058_v16 = vpack.c.bf16 %v1281_v14, %v1273_v53  ;;  %v1152_v54 = vadd.f32 %v3776_v42, %v4948_v59  ;;  %v4954_v53 = vld [vmem:[#allocation5_spill] sm:$0xff]  ;;  %v4959_v59 = vld [vmem:[#allocation52_spill] sm:$0xff] }
  0xf6   : > { %v1317_v41 = vmax.f32 %v1189_v34, 0.0  ;;  %v1314_v23 = vmax.f32 %v1186_v19, 0.0  ;;  %v1316_v49 = vmax.f32 %v1188_v45, 0.0  ;;  %4945 = vst [vmem:[#allocation63_spill] sm:$0xff] %v4055_v44  ;;  %v4949_v48 = vmax.f32 %v3925_v28, 0.0  ;;  %v4956_v45 = vld [vmem:[#allocation6_spill] sm:$0xff] }
  0xf7   : > { %4946 = vst [vmem:[#allocation11_spill] sm:$0xff] %v4058_v16  ;;  %v4060_v30 = vpack.c.bf16 %v1278_v1, %v1270_v10  ;;  %v4950_v40 = vmax.f32 %v3939_v55, 0.0  ;;  %v4951_v62 = vmax.f32 %v3942_v58, 0.0  ;;  %v4952_v27 = vmax.f32 %v3945_v31, 0.0  ;;  %v4953_v58 = vld [vmem:[#allocation65_spill] sm:$0xff] }
  0xf8   : > { %v2725_v60 = vpack.c.bf16 %v4949_v48, %v1315_v22  ;;  %v603_v14 = vmul.f32 %v3397_v32, %v4055_v44  ;;  %v605_v1 = vmul.f32 %v3441_v50, %v4055_v44  ;;  %v602_v42 = vmul.f32 %v3444_v51, %v4055_v44  ;;  %v4955_v31 = vld [vmem:[#allocation61_spill] sm:$0xff] }
  0xf9   : > { %4947 = vst [vmem:[#allocation10_spill] sm:$0xff] %v4060_v30  ;;  %v2757_v18 = vpack.c.bf16 %v4950_v40, %v1317_v41  ;;  %v2727_v4 = vpack.c.bf16 %v4951_v62, %v1314_v23  ;;  %v2759_v37 = vpack.c.bf16 %v4952_v27, %v1316_v49  ;;  %v604_v28 = vmul.f32 %v3447_v52, %v4055_v44  ;;  %v4086_v22 = vpop.permute.xlu1 %419  ;;  %v4958_v23 = vld [vmem:[#allocation51_spill] sm:$0xff]  ;;  %v4960_v62 = vld [vmem:[#allocation53_spill] sm:$0xff] }
  0xfa   : > { %2726 = vmatprep.subr.bf16.mxu0 %v2725_v60  ;;  %v1280_v55 = vmax.f32 %v1152_v54, 0.0  ;;  %v815_v34 = vmul.f32 %v4954_v53, %v4953_v58  ;;  %v1159_v19 = vadd.f32 %v3816_v20, %v4955_v31  ;;  %v817_v10 = vmul.f32 %v4956_v45, %v4953_v58  ;;  %4957 = vst [vmem:[#allocation20_spill] sm:$0xff] %v4086_v22 }
  0xfb   : > { %2758 = vmatprep.subr.bf16.mxu1 %v2757_v18  ;;  %2728 = vmatpush1.bf16.msra.mxu0 %v2727_v4  ;;  %v4090_v49 = vadd.f32 %v4958_v23, %v603_v14  ;;  %v4093_v54 = vadd.f32 %v4959_v59, %v605_v1  ;;  %v1272_v48 = vmax.f32 %v1144_v11, 0.0  ;;  %v611_v60 = vmul.f32 %v3397_v32, %v4086_v22  ;;  %v4963_v23 = vld [vmem:[#allocation62_spill] sm:$0xff] }
  0xfc   : > { %2760 = vmatpush1.bf16.msra.mxu1 %v2759_v37  ;;  %v613_v40 = vmul.f32 %v3441_v50, %v4086_v22  ;;  %v610_v18 = vmul.f32 %v3444_v51, %v4086_v22  ;;  %v4102_v4 = vadd.f32 %v4960_v62, %v602_v42  ;;  %v612_v27 = vmul.f32 %v3447_v52, %v4086_v22  ;;  %v4961_v37 = vld [vmem:[#allocation54_spill] sm:$0xff]  ;;  %v4964_v42 = vld [vmem:[#allocation7_spill] sm:$0xff] }
  0xfd   : > { %v4107_v14 = vadd.f32 %v4961_v37, %v604_v28  ;;  %v4109_v1 = vpack.c.bf16 %v1280_v55, %v1272_v48  ;;  %v943_v11 = vadd.f32 %v815_v34, %v3804_v21  ;;  %v945_v31 = vadd.f32 %v817_v10, %v3847_v47  ;;  %v4965_v28 = vld [vmem:[#allocation55_spill] sm:$0xff]  ;;  %v4966_v37 = vld [vmem:[#allocation22_spill] sm:$0xff] }
  0xfe   : > { %v1161_v59 = vadd.f32 %v3816_v20, %v4963_v23  ;;  %v550_v41 = vmul.f32 %v4910_v61, %v3644_v0  ;;  %v814_v62 = vmul.f32 %v4964_v42, %v4953_v58  ;;  %v1287_v43 = vmax.f32 %v1159_v19, 0.0  ;;  %v4124_v34 = vpop.permute.xlu1 %687  ;;  %v4968_v23 = vld [vmem:[#allocation56_spill] sm:$0xff] }
  0xff   : > { %4962 = vst [vmem:[#allocation64_spill] sm:$0xff] %v4109_v1  ;;  %v1167_v8 = vadd.f32 %v3788_v63, %v943_v11  ;;  %v934_v55 = vadd.f32 %v4966_v37, %v4965_v28  ;;  %v552_v21 = vmul.f32 %v4914_v56, %v3644_v0  ;;  %4967 = vst [vmem:[#allocation12_spill] sm:$0xff] %v4124_v34 }
 0x100   : > { %v1169_v47 = vadd.f32 %v3788_v63, %v945_v31  ;;  %v1289_v10 = vmax.f32 %v1161_v59, 0.0  ;;  %v942_v48 = vadd.f32 %v814_v62, %v550_v41  ;;  %v936_v22 = vadd.f32 %v4969_v39, %v4968_v23 }
 0x101   : > { %v875_v44 = vmul.f32 %v3389_v26, %v4124_v34  ;;  %v877_v19 = vmul.f32 %v3400_v35, %v4124_v34  ;;  %v874_v11 = vmul.f32 %v3403_v36, %v4124_v34  ;;  %v876_v0 = vmul.f32 %v4900_v24, %v4124_v34 }
 0x102   : > { %v1295_v28 = vmax.f32 %v1167_v8, 0.0  ;;  %v1297_v37 = vmax.f32 %v1169_v47, 0.0  ;;  %v1158_v31 = vadd.f32 %v3816_v20, %v934_v55  ;;  %v1166_v41 = vadd.f32 %v3788_v63, %v942_v48 }
 0x103   : > { %v1003_v59 = vadd.f32 %v875_v44, %v611_v60  ;;  %v1005_v39 = vadd.f32 %v877_v19, %v613_v40  ;;  %v1002_v62 = vadd.f32 %v874_v11, %v610_v18  ;;  %v1004_v23 = vadd.f32 %v876_v0, %v612_v27  ;;  %v4147_v8 = vpop.permute.xlu1 %1094 }
 0x104   : > { %v4141_v1 = vpack.c.bf16 %v1295_v28, %v1287_v43  ;;  %v4143_v30 = vpack.c.bf16 %v1297_v37, %v1289_v10  ;;  %v1286_v16 = vmax.f32 %v1158_v31, 0.0  ;;  %v816_v34 = vmul.f32 %v4970_v5, %v4953_v58 }
 0x105   : > { %v4150_v55 = vadd.f32 %v4139_v2, %v1003_v59  ;;  %v4153_v44 = vadd.f32 %v4139_v2, %v1005_v39  ;;  %v4156_v60 = vadd.f32 %v4139_v2, %v1002_v62  ;;  %v1294_v40 = vmax.f32 %v1166_v41, 0.0 }
 0x106   : > { %v1203_v43 = vadd.f32 %v4147_v8, %v3974_v17  ;;  %v1205_v18 = vadd.f32 %v4147_v8, %v3983_v7  ;;  %v1202_v58 = vadd.f32 %v4147_v8, %v3986_v3  ;;  %v1204_v27 = vadd.f32 %v4147_v8, %v4011_v6 }
 0x107   : > { %v4170_v19 = vadd.f32 %v4139_v2, %v1004_v23  ;;  %v4172_v7 = vpop.permute.xlu1 %424  ;;  %v4174_v37 = vpack.c.bf16 %v1294_v40, %v1286_v16  ;;  %v944_v3 = vadd.f32 %v816_v34, %v552_v21  ;;  %v1160_v6 = vadd.f32 %v3816_v20, %v936_v22  ;;  %v4977_v34 = vld [vmem:[#allocation69_spill] sm:$0xff] }
 0x108   : > { %v1331_v11 = vmax.f32 %v1203_v43, 0.0  ;;  %v1333_v17 = vmax.f32 %v1205_v18, 0.0  ;;  %v1330_v0 = vmax.f32 %v1202_v58, 0.0  ;;  %v1332_v28 = vmax.f32 %v1204_v27, 0.0  ;;  %4971 = vst [vmem:[#allocation43_spill] sm:$0xff] %v4172_v7 }
 0x109   : > { %v559_v31 = vmul.f32 %v3231_v29, %v3752_v46  ;;  %v4972_v41 = vmax.f32 %v4034_v13, 0.0  ;;  %v4973_v39 = vmax.f32 %v4037_v9, 0.0  ;;  %v4974_v23 = vmax.f32 %v4040_v25, 0.0 }
 0x10a   : > { %v4975_v18 = vmax.f32 %v4053_v57, 0.0  ;;  %v619_v16 = vmul.f32 %v3397_v32, %v4172_v7  ;;  %v621_v20 = vmul.f32 %v3441_v50, %v4172_v7  ;;  %v618_v22 = vmul.f32 %v3444_v51, %v4172_v7  ;;  %v4976_v57 = vld [vmem:[#allocation68_spill] sm:$0xff] }
 0x10b   : > { %v2729_v59 = vpack.c.bf16 %v4972_v41, %v1331_v11  ;;  %v2761_v62 = vpack.c.bf16 %v4973_v39, %v1333_v17  ;;  %v2731_v43 = vpack.c.bf16 %v4974_v23, %v1330_v0  ;;  %v620_v13 = vmul.f32 %v3447_v52, %v4172_v7  ;;  %v4201_v27 = vpop.permute.xlu1 %429  ;;  %v4979_v11 = vld [vmem:[#allocation57_spill] sm:$0xff]  ;;  %v4980_v0 = vld [vmem:[#allocation58_spill] sm:$0xff]  ;;  %v4981_v41 = vld [vmem:[#allocation59_spill] sm:$0xff] }
 0x10c   : > { %v2763_v58 = vpack.c.bf16 %v4975_v18, %v1332_v28  ;;  %v1168_v25 = vadd.f32 %v3788_v63, %v944_v3  ;;  %v567_v21 = vmul.f32 %v3231_v29, %v4976_v57  ;;  %v831_v40 = vmul.f32 %v4954_v53, %v4977_v34  ;;  %4978 = vst [vmem:[#allocation44_spill] sm:$0xff] %v4201_v27 }
 0x10d   : > { %2730 = vmatprep.subr.bf16.mxu0 %v2729_v59  ;;  %2762 = vmatprep.subr.bf16.mxu1 %v2761_v62  ;;  %v4204_v17 = vadd.f32 %v4979_v11, %v619_v16  ;;  %v4207_v28 = vadd.f32 %v4980_v0, %v621_v20  ;;  %v4210_v59 = vadd.f32 %v4981_v41, %v618_v22  ;;  %v1288_v63 = vmax.f32 %v1160_v6, 0.0  ;;  %v4983_v16 = vld [vmem:[#allocation24_spill] sm:$0xff] }
 0x10e   : > { %2732 = vmatpush1.bf16.msra.mxu0 %v2731_v43  ;;  %2764 = vmatpush1.bf16.msra.mxu1 %v2763_v58  ;;  %v627_v3 = vmul.f32 %v3397_v32, %v4201_v27  ;;  %v629_v39 = vmul.f32 %v3441_v50, %v4201_v27  ;;  %v626_v62 = vmul.f32 %v3444_v51, %v4201_v27  ;;  %v4982_v43 = vld [vmem:[#allocation60_spill] sm:$0xff]  ;;  %v1296_v58 = vmax.f32 %v1168_v25, 0.0 }
 0x10f   : > { %v628_v23 = vmul.f32 %v3447_v52, %v4201_v27  ;;  %v1012_v18 = vadd.f32 %v4982_v43, %v620_v13  ;;  %v951_v20 = vadd.f32 %v4983_v16, %v559_v31  ;;  %v959_v22 = vadd.f32 %v831_v40, %v567_v21  ;;  %v4984_v13 = vld [vmem:[#allocation70_spill] sm:$0xff]  ;;  %v4985_v40 = vld [vmem:[#allocation25_spill] sm:$0xff] }
 0x110   : > { %v561_v6 = vmul.f32 %v3256_v38, %v3752_v46  ;;  %v569_v32 = vmul.f32 %v3256_v38, %v4976_v57  ;;  %v833_v50 = vmul.f32 %v4956_v45, %v4977_v34  ;;  %v558_v51 = vmul.f32 %v4910_v61, %v3752_v46  ;;  %v4236_v21 = vpop.permute.xlu1 %695  ;;  %v4986_v16 = vld [vmem:[#allocation26_spill] sm:$0xff] }
 0x111   : > { %v4230_v11 = vpack.c.bf16 %v1296_v58, %v1288_v63  ;;  %v1175_v52 = vadd.f32 %v3922_v15, %v951_v20  ;;  %v1183_v25 = vadd.f32 %v4984_v13, %v959_v22  ;;  %v566_v31 = vmul.f32 %v4910_v61, %v4976_v57 }
 0x112   : > { %v953_v0 = vadd.f32 %v4985_v40, %v561_v6  ;;  %v961_v41 = vadd.f32 %v833_v50, %v569_v32  ;;  %v830_v43 = vmul.f32 %v4964_v42, %v4977_v34  ;;  %v950_v9 = vadd.f32 %v4986_v16, %v558_v51 }
 0x113   : > { %v891_v63 = vmul.f32 %v3389_v26, %v4236_v21  ;;  %v893_v58 = vmul.f32 %v3400_v35, %v4236_v21  ;;  %v890_v20 = vmul.f32 %v3403_v36, %v4236_v21  ;;  %v892_v22 = vmul.f32 %v4900_v24, %v4236_v21 }
 0x114   : > { %v1303_v48 = vmax.f32 %v1175_v52, 0.0  ;;  %v1311_v6 = vmax.f32 %v1183_v25, 0.0  ;;  %v1177_v32 = vadd.f32 %v3922_v15, %v953_v0  ;;  %v1185_v50 = vadd.f32 %v4984_v13, %v961_v41  ;;  %v4987_v25 = vld [vmem:[#allocation27_spill] sm:$0xff] }
 0x115   : > { %v1019_v40 = vadd.f32 %v891_v63, %v627_v3  ;;  %v1021_v51 = vadd.f32 %v893_v58, %v629_v39  ;;  %v1018_v16 = vadd.f32 %v890_v20, %v626_v62  ;;  %v1020_v10 = vadd.f32 %v892_v22, %v628_v23  ;;  %v4254_v7 = vpop.permute.xlu1 %1104  ;;  %v4988_v58 = vld [vmem:[#allocation71_spill] sm:$0xff] }
 0x116   : > { %v4252_v26 = vpack.c.bf16 %v1311_v6, %v1303_v48  ;;  %v1305_v47 = vmax.f32 %v1177_v32, 0.0  ;;  %v1313_v35 = vmax.f32 %v1185_v50, 0.0  ;;  %v958_v27 = vadd.f32 %v830_v43, %v566_v31 }
 0x117   : > { %v1174_v36 = vadd.f32 %v3922_v15, %v950_v9  ;;  %v560_v24 = vmul.f32 %v4914_v56, %v3752_v46  ;;  %v568_v52 = vmul.f32 %v4914_v56, %v4976_v57  ;;  %v832_v3 = vmul.f32 %v4970_v5, %v4977_v34 }
 0x118   : > { %v1219_v48 = vadd.f32 %v4254_v7, %v4090_v49  ;;  %v1221_v39 = vadd.f32 %v4254_v7, %v4093_v54  ;;  %v1218_v62 = vadd.f32 %v4254_v7, %v4102_v4  ;;  %v1220_v9 = vadd.f32 %v4254_v7, %v4107_v14 }
 0x119   : > { %v4271_v23 = vpack.c.bf16 %v1313_v35, %v1305_v47  ;;  %v1182_v46 = vadd.f32 %v4984_v13, %v958_v27  ;;  %v1302_v57 = vmax.f32 %v1174_v36, 0.0  ;;  %v952_v31 = vadd.f32 %v4987_v25, %v560_v24  ;;  %v4275_v43 = vpop.permute.xlu1 %1114 }
 0x11a   : > { %v1347_v34 = vmax.f32 %v1219_v48, 0.0  ;;  %v1349_v0 = vmax.f32 %v1221_v39, 0.0  ;;  %v1346_v41 = vmax.f32 %v1218_v62, 0.0  ;;  %v1348_v49 = vmax.f32 %v1220_v9, 0.0 }
 0x11b   : > { %v1310_v54 = vmax.f32 %v1182_v46, 0.0  ;;  %v960_v63 = vadd.f32 %v832_v3, %v568_v52  ;;  %v1176_v4 = vadd.f32 %v3922_v15, %v952_v31  ;;  %v575_v14 = vmul.f32 %v3231_v29, %v4988_v58  ;;  %v4995_v31 = vld [vmem:[#allocation37_spill] sm:$0xff] }
 0x11c   : > { %v4989_v47 = vmax.f32 %v4150_v55, 0.0  ;;  %v4990_v27 = vmax.f32 %v4153_v44, 0.0  ;;  %v4991_v6 = vmax.f32 %v4156_v60, 0.0  ;;  %v4992_v50 = vmax.f32 %v4170_v19, 0.0  ;;  %v4993_v19 = vld [vmem:[#allocation29_spill] sm:$0xff] }
 0x11d   : > { %v1235_v36 = vadd.f32 %v4275_v43, %v4204_v17  ;;  %v1237_v15 = vadd.f32 %v4275_v43, %v4207_v28  ;;  %v1234_v24 = vadd.f32 %v4275_v43, %v4210_v59  ;;  %v1236_v55 = vadd.f32 %v4275_v43, %v1012_v18  ;;  %v4300_v48 = vpop.permute.xlu1 %1119 }
 0x11e   : > { %v2733_v20 = vpack.c.bf16 %v4989_v47, %v1347_v34  ;;  %v2765_v22 = vpack.c.bf16 %v4990_v27, %v1349_v0  ;;  %v2735_v32 = vpack.c.bf16 %v4991_v6, %v1346_v41  ;;  %v2767_v35 = vpack.c.bf16 %v4992_v50, %v1348_v49 }
 0x11f   : > { %v4295_v44 = vpack.c.bf16 %v1310_v54, %v1302_v57  ;;  %v1184_v60 = vadd.f32 %v4984_v13, %v960_v63  ;;  %v1304_v52 = vmax.f32 %v1176_v4, 0.0  ;;  %v583_v3 = vmul.f32 %v3231_v29, %v4993_v19  ;;  %v4994_v57 = vld [vmem:[#allocation17_spill] sm:$0xff] }
 0x120   : > { %2734 = vmatprep.subr.bf16.mxu0 %v2733_v20  ;;  %2766 = vmatprep.subr.bf16.mxu1 %v2765_v22  ;;  %v1363_v17 = vmax.f32 %v1235_v36, 0.0  ;;  %v1365_v28 = vmax.f32 %v1237_v15, 0.0  ;;  %v1362_v39 = vmax.f32 %v1234_v24, 0.0  ;;  %v1364_v59 = vmax.f32 %v1236_v55, 0.0  ;;  %v4329_v24 = vld [vmem:[%s4763_s3] sm:$0xff] }
 0x121   : > { %2736 = vmatpush1.bf16.msra.mxu0 %v2735_v32  ;;  %2768 = vmatpush1.bf16.msra.mxu1 %v2767_v35  ;;  %v1243_v18 = vadd.f32 %v4300_v48, %v1019_v40  ;;  %v1245_v62 = vadd.f32 %v4300_v48, %v1021_v51  ;;  %v1242_v9 = vadd.f32 %v4300_v48, %v1018_v16  ;;  %v1312_v46 = vmax.f32 %v1184_v60, 0.0  ;;  %v4996_v32 = vld [vmem:[#allocation38_spill] sm:$0xff] }
 0x122   : > { %v1244_v13 = vadd.f32 %v4300_v48, %v1020_v10  ;;  %v847_v25 = vmul.f32 %v4954_v53, %v4994_v57  ;;  %v967_v34 = vadd.f32 %v4995_v31, %v575_v14  ;;  %v577_v0 = vmul.f32 %v3256_v38, %v4988_v58 }
 0x123   : > { %v1371_v41 = vmax.f32 %v1243_v18, 0.0  ;;  %v1373_v49 = vmax.f32 %v1245_v62, 0.0  ;;  %v1370_v54 = vmax.f32 %v1242_v9, 0.0  ;;  %v4311_v40 = vpack.c.bf16 %v1312_v46, %v1304_v52 }
 0x124   : > { %v1372_v63 = vmax.f32 %v1244_v13, 0.0  ;;  %v975_v51 = vadd.f32 %v847_v25, %v583_v3  ;;  %v1191_v16 = vadd.f32 %v4031_v33, %v967_v34  ;;  %v585_v10 = vmul.f32 %v3256_v38, %v4993_v19  ;;  %v5000_v34 = vld [vmem:[#allocation40_spill] sm:$0xff] }
 0x125   : > { %v2737_v4 = vpack.c.bf16 %v1371_v41, %v1363_v17  ;;  %v2769_v47 = vpack.c.bf16 %v1373_v49, %v1365_v28  ;;  %v2739_v20 = vpack.c.bf16 %v1370_v54, %v1362_v39  ;;  %v849_v6 = vmul.f32 %v4956_v45, %v4994_v57  ;;  %v4997_v17 = vld [vmem:[#allocation30_spill] sm:$0xff]  ;;  %v4999_v39 = vld [vmem:[#allocation39_spill] sm:$0xff]  ;;  %v5001_v41 = vld [vmem:[#allocation41_spill] sm:$0xff] }
 0x126   : > { %v2771_v27 = vpack.c.bf16 %v1372_v63, %v1364_v59  ;;  %v1199_v14 = vadd.f32 %v3914_v12, %v975_v51  ;;  %v1319_v22 = vmax.f32 %v1191_v16, 0.0  ;;  %v969_v50 = vadd.f32 %v4996_v32, %v577_v0  ;;  %v4998_v28 = vld [vmem:[#allocation18_spill] sm:$0xff]  ;;  %v5003_v63 = vld [vmem:[#allocation31_spill] sm:$0xff] }
 0x127   : > { %2738 = vmatprep.subr.bf16.mxu0 %v2737_v4  ;;  %2770 = vmatprep.subr.bf16.mxu1 %v2769_v47  ;;  %v574_v35 = vmul.f32 %v4910_v61, %v4988_v58  ;;  %v582_v36 = vmul.f32 %v4910_v61, %v4993_v19  ;;  %v846_v15 = vmul.f32 %v4964_v42, %v4994_v57  ;;  %v4354_v49 = vld [vmem:[%s4763_s3 + $0x8] sm:$0xff]  ;;  %v5005_v4 = vld [vmem:[#allocation9_spill] sm:$0xff]  ;;  %v5006_v47 = vld [vmem:[#allocation11_spill] sm:$0xff]  ;;  %v5008_v32 = vmov 0.0  }
 0x128   : > { %2740 = vmatpush1.bf16.msra.mxu0 %v2739_v20  ;;  %2772 = vmatpush1.bf16.msra.mxu1 %v2771_v27  ;;  %v1327_v55 = vmax.f32 %v1199_v14, 0.0  ;;  %v977_v60 = vadd.f32 %v849_v6, %v585_v10  ;;  %v1193_v52 = vadd.f32 %v4031_v33, %v969_v50  ;;  %v576_v3 = vmul.f32 %v4914_v56, %v4988_v58  ;;  %v5004_v16 = vld [vmem:[#allocation42_spill] sm:$0xff] }
 0x129   : > { %2774 = vmatprep.subr.bf16.mxu0 %v4997_v17  ;;  %2806 = vmatprep.subr.bf16.mxu1 %v4998_v28  ;;  %v966_v59 = vadd.f32 %v4999_v39, %v574_v35  ;;  %v974_v18 = vadd.f32 %v846_v15, %v582_v36  ;;  %v584_v62 = vmul.f32 %v4914_v56, %v4993_v19  ;;  %v5002_v19 = vld [vmem:[#allocation32_spill] sm:$0xff]  ;;  %v5009_v36 = vld [vmem:[#allocation19_spill] sm:$0xff] }
 0x12a   : > { %v4339_v9 = vpack.c.bf16 %v1327_v55, %v1319_v22  ;;  %v1201_v13 = vadd.f32 %v3914_v12, %v977_v60  ;;  %v1321_v46 = vmax.f32 %v1193_v52, 0.0  ;;  %v848_v25 = vmul.f32 %v4970_v5, %v4994_v57  ;;  %v5007_v22 = vld [vmem:[#allocation28_spill] sm:$0xff] }
 0x12b   : > { %1499 = vmatmul.mubr.f32.vlgmr.msra.gmra.mrb[0].mxu0 %v4329_v24  ;;  %1612 = vmatmul.mubr.f32.vlgmr.msra.gmra.mrb[0].mxu1 %v4329_v24  ;;  %v1190_v58 = vadd.f32 %v4031_v33, %v966_v59  ;;  %v1198_v31 = vadd.f32 %v3914_v12, %v974_v18  ;;  %v968_v0 = vadd.f32 %v5000_v34, %v576_v3  ;;  %v5010_v3 = vld [vmem:[#allocation10_spill] sm:$0xff]  ;;  %v5011_v17 = vld [vmem:[#allocation64_spill] sm:$0xff] }
 0x12c   : > { %2776 = vmatpush1.bf16.msra.mxu0 %v5001_v41  ;;  %2808 = vmatpush1.bf16.msra.mxu1 %v5002_v19  ;;  %v1329_v57 = vmax.f32 %v1201_v13, 0.0  ;;  %v976_v54 = vadd.f32 %v848_v25, %v584_v62  ;;  %v591_v51 = vmul.f32 %v3231_v29, %v5003_v63  ;;  %v599_v10 = vmul.f32 %v3231_v29, %v5004_v16  ;;  %v4408_v19 = vld [vmem:[%s4763_s3 + $0x18] sm:$0xff] }
 0x12d   : > { %2778 = vmatprep.subr.bf16.mxu0 %v5005_v4  ;;  %2810 = vmatprep.subr.bf16.mxu1 %v5006_v47  ;;  %v1318_v20 = vmax.f32 %v1190_v58, 0.0  ;;  %v1326_v27 = vmax.f32 %v1198_v31, 0.0  ;;  %v1192_v14 = vadd.f32 %v4031_v33, %v968_v0  ;;  %v855_v6 = vmul.f32 %v4954_v53, %v5007_v22  ;;  %v5012_v58 = vld [vmem:[#allocation66_spill] sm:$0xff] }
 0x12e   : > { %1504 = vmatprep.mubr.f32.mxu0 %v5008_v32  ;;  %1617 = vmatprep.mubr.f32.mxu1 %v5008_v32  ;;  %v2821_v50 = vpack.c.bf16 %v1329_v57, %v1321_v46  ;;  %v1200_v35 = vadd.f32 %v3914_v12, %v976_v54  ;;  %v863_v15 = vmul.f32 %v4954_v53, %v5009_v36  ;;  %v4381_v12 = vld [vmem:[%s4763_s3 + $0x10] sm:$0xff] }
 0x12f   : > { %1505 = vmatmul.mubr.f32.gmra.mrb[2].mxu0 %v4354_v49  ;;  %1618 = vmatmul.mubr.f32.gmra.mrb[2].mxu1 %v4354_v49  ;;  %v4372_v55 = vpack.c.bf16 %v1326_v27, %v1318_v20  ;;  %v1320_v33 = vmax.f32 %v1192_v14, 0.0  ;;  %v983_v60 = vadd.f32 %v855_v6, %v591_v51  ;;  %v593_v52 = vmul.f32 %v3256_v38, %v5003_v63  ;;  %v5013_v14 = vld [vmem:[#allocation63_spill] sm:$0xff] }
 0x130   : > { %2780 = vmatpush1.bf16.msra.mxu0 %v5010_v3  ;;  %2812 = vmatpush1.bf16.msra.mxu1 %v5011_v17  ;;  %v1328_v28 = vmax.f32 %v1200_v35, 0.0  ;;  %v991_v39 = vadd.f32 %v863_v15, %v599_v10  ;;  %v601_v59 = vmul.f32 %v3256_v38, %v5004_v16  ;;  %v857_v18 = vmul.f32 %v4956_v45, %v5007_v22 }
 0x131   : > { %2782 = vmatprep.subr.bf16.mxu0 %v4141_v1  ;;  %2814 = vmatprep.subr.bf16.mxu1 %v4143_v30  ;;  %v1207_v62 = vadd.f32 %v4147_v8, %v983_v60  ;;  %v865_v13 = vmul.f32 %v4956_v45, %v5009_v36  ;;  %v590_v46 = vmul.f32 %v4910_v61, %v5003_v63 }
 0x132   : > { %1510 = vmatprep.mubr.f32.mxu0 %v5008_v32  ;;  %1623 = vmatprep.mubr.f32.mxu1 %v5008_v32  ;;  %v2823_v25 = vpack.c.bf16 %v1328_v28, %v1320_v33  ;;  %v1215_v31 = vadd.f32 %v5012_v58, %v991_v39  ;;  %v985_v34 = vadd.f32 %v857_v18, %v593_v52  ;;  %v5014_v33 = vld [vmem:[#allocation20_spill] sm:$0xff] }
 0x133   : > { %1511 = vmatmul.mubr.f32.gmra.mrb[4].mxu0 %v4381_v12  ;;  %1624 = vmatmul.mubr.f32.gmra.mrb[4].mxu1 %v4381_v12  ;;  %v1335_v30 = vmax.f32 %v1207_v62, 0.0  ;;  %v993_v1 = vadd.f32 %v865_v13, %v601_v59  ;;  %v598_v0 = vmul.f32 %v4910_v61, %v5004_v16  ;;  %v854_v41 = vmul.f32 %v4964_v42, %v5007_v22  ;;  %v5016_v39 = vld [vmem:[#allocation12_spill] sm:$0xff] }
 0x134   : > { %2784 = vmatpush1.bf16.msra.mxu0 %v4174_v37  ;;  %2816 = vmatpush1.bf16.msra.mxu1 %v4230_v11  ;;  %v1343_v57 = vmax.f32 %v1215_v31, 0.0  ;;  %v1209_v54 = vadd.f32 %v4147_v8, %v985_v34  ;;  %v862_v51 = vmul.f32 %v4964_v42, %v5009_v36  ;;  %v592_v10 = vmul.f32 %v4914_v56, %v5003_v63 }
 0x135   : > { %2786 = vmatprep.subr.bf16.mxu0 %v4252_v26  ;;  %2818 = vmatprep.subr.bf16.mxu1 %v4271_v23  ;;  %v1217_v37 = vadd.f32 %v5012_v58, %v993_v1  ;;  %v982_v11 = vadd.f32 %v854_v41, %v590_v46  ;;  %v600_v4 = vmul.f32 %v4914_v56, %v5004_v16 }
 0x136   : > { %1516 = vmatprep.mubr.f32.mxu0 %v5008_v32  ;;  %1629 = vmatprep.mubr.f32.mxu1 %v5008_v32  ;;  %v2793_v47 = vpack.c.bf16 %v1343_v57, %v1335_v30  ;;  %v1337_v20 = vmax.f32 %v1209_v54, 0.0  ;;  %v990_v27 = vadd.f32 %v862_v51, %v598_v0  ;;  %v856_v63 = vmul.f32 %v4970_v5, %v5007_v22  ;;  %v4436_v22 = vld [vmem:[%s4763_s3 + $0x20] sm:$0xff] }
 0x137   : > { %1517 = vmatmul.mubr.f32.gmra.mrb[6].mxu0 %v4408_v19  ;;  %1630 = vmatmul.mubr.f32.gmra.mrb[6].mxu1 %v4408_v19  ;;  %v1345_v26 = vmax.f32 %v1217_v37, 0.0  ;;  %v1206_v23 = vadd.f32 %v4147_v8, %v982_v11  ;;  %v864_v16 = vmul.f32 %v4970_v5, %v5009_v36  ;;  %v607_v6 = vmul.f32 %v3231_v29, %v5013_v14 }
 0x138   : > { %2788 = vmatpush1.bf16.msra.mxu0 %v4295_v44  ;;  %2820 = vmatpush1.bf16.msra.mxu1 %v4311_v40  ;;  %v1214_v35 = vadd.f32 %v5012_v58, %v990_v27  ;;  %v984_v15 = vadd.f32 %v856_v63, %v592_v10  ;;  %v615_v60 = vmul.f32 %v3231_v29, %v5014_v33  ;;  %v5015_v44 = vld [vmem:[#allocation36_spill] sm:$0xff] }
 0x139   : > { %2790 = vmatprep.subr.bf16.mxu0 %v4339_v9  ;;  %2822 = vmatprep.subr.bf16.mxu1 %v2821_v50  ;;  %v2825_v36 = vpack.c.bf16 %v1345_v26, %v1337_v20  ;;  %v1334_v52 = vmax.f32 %v1206_v23, 0.0  ;;  %v992_v3 = vadd.f32 %v864_v16, %v600_v4  ;;  %v871_v40 = vmul.f32 %v4954_v53, %v5015_v44  ;;  %v4483_v4 = vld [vmem:[%s4763_s3 + $0x30] sm:$0xff] }
 0x13a   : > { %1522 = vmatprep.mubr.f32.mxu0 %v5008_v32  ;;  %1635 = vmatprep.mubr.f32.mxu1 %v5008_v32  ;;  %v1342_v17 = vmax.f32 %v1214_v35, 0.0  ;;  %v1208_v28 = vadd.f32 %v4147_v8, %v984_v15  ;;  %v879_v59 = vmul.f32 %v4954_v53, %v5016_v39  ;;  %v609_v9 = vmul.f32 %v3256_v38, %v5013_v14  ;;  %v4460_v8 = vld [vmem:[%s4763_s3 + $0x28] sm:$0xff] }
 0x13b   : > { %1523 = vmatmul.mubr.f32.gmra.mrb[8].mxu0 %v4436_v22  ;;  %1636 = vmatmul.mubr.f32.gmra.mrb[8].mxu1 %v4436_v22  ;;  %v1216_v50 = vadd.f32 %v5012_v58, %v992_v3  ;;  %v999_v18 = vadd.f32 %v871_v40, %v607_v6  ;;  %v617_v62 = vmul.f32 %v3256_v38, %v5014_v33  ;;  %v5018_v40 = vld [vmem:[#allocation44_spill] sm:$0xff] }
 0x13c   : > { %2792 = vmatpush1.bf16.msra.mxu0 %v4372_v55  ;;  %2824 = vmatpush1.bf16.msra.mxu1 %v2823_v25  ;;  %v2795_v13 = vpack.c.bf16 %v1342_v17, %v1334_v52  ;;  %v1336_v46 = vmax.f32 %v1208_v28, 0.0  ;;  %v1007_v31 = vadd.f32 %v879_v59, %v615_v60  ;;  %v873_v34 = vmul.f32 %v4956_v45, %v5015_v44  ;;  %v5019_v17 = vld [vmem:[#allocation46_spill] sm:$0xff] }
 0x13d   : > { %2794 = vmatprep.subr.bf16.mxu0 %v2793_v47  ;;  %2826 = vmatprep.subr.bf16.mxu1 %v2825_v36  ;;  %v1344_v58 = vmax.f32 %v1216_v50, 0.0  ;;  %v1223_v30 = vadd.f32 %v4254_v7, %v999_v18  ;;  %v881_v55 = vmul.f32 %v4956_v45, %v5016_v39  ;;  %v606_v25 = vmul.f32 %v4910_v61, %v5013_v14  ;;  %v5017_v36 = vld [vmem:[#allocation43_spill] sm:$0xff] }
 0x13e   : > { %1528 = vmatprep.mubr.f32.mxu0 %v5008_v32  ;;  %1641 = vmatprep.mubr.f32.mxu1 %v5008_v32  ;;  %v1231_v1 = vadd.f32 %v4139_v2, %v1007_v31  ;;  %v1001_v0 = vadd.f32 %v873_v34, %v609_v9  ;;  %v614_v41 = vmul.f32 %v4910_v61, %v5014_v33 }
 0x13f   : > { %1529 = vmatmul.mubr.f32.gmra.mrb[10].mxu0 %v4460_v8  ;;  %1642 = vmatmul.mubr.f32.gmra.mrb[10].mxu1 %v4460_v8  ;;  %v2827_v57 = vpack.c.bf16 %v1344_v58, %v1336_v46  ;;  %v1351_v54 = vmax.f32 %v1223_v30, 0.0  ;;  %v1009_v51 = vadd.f32 %v881_v55, %v617_v62  ;;  %v870_v10 = vmul.f32 %v4964_v42, %v5015_v44 }
 0x140   : > { %2796 = vmatpush1.bf16.msra.mxu0 %v2795_v13  ;;  %v1359_v37 = vmax.f32 %v1231_v1, 0.0  ;;  %v1225_v11 = vadd.f32 %v4254_v7, %v1001_v0  ;;  %1534 = vmatprep.mubr.f32.mxu0 %v5008_v32  ;;  %v878_v47 = vmul.f32 %v4964_v42, %v5016_v39  ;;  %v608_v20 = vmul.f32 %v4914_v56, %v5013_v14 }
 0x141   : > { %2828 = vmatpush1.bf16.msra.mxu1 %v2827_v57  ;;  %v1233_v27 = vadd.f32 %v4139_v2, %v1009_v51  ;;  %1647 = vmatprep.mubr.f32.mxu1 %v5008_v32  ;;  %v998_v63 = vadd.f32 %v870_v10, %v606_v25  ;;  %v616_v26 = vmul.f32 %v4914_v56, %v5014_v33 }
 0x142   : > { %v2797_v23 = vpack.c.bf16 %v1359_v37, %v1351_v54  ;;  %v1353_v16 = vmax.f32 %v1225_v11, 0.0  ;;  %v1006_v6 = vadd.f32 %v878_v47, %v614_v41  ;;  %v872_v35 = vmul.f32 %v4970_v5, %v5015_v44 }
 0x143   : > { %v1361_v15 = vmax.f32 %v1233_v27, 0.0  ;;  %1535 = vmatmul.mubr.f32.gmra.mrb[12].mxu0 %v4483_v4  ;;  %1648 = vmatmul.mubr.f32.gmra.mrb[12].mxu1 %v4483_v4  ;;  %v1222_v14 = vadd.f32 %v4254_v7, %v998_v63  ;;  %v880_v60 = vmul.f32 %v4970_v5, %v5016_v39  ;;  %v623_v52 = vmul.f32 %v3231_v29, %v5017_v36  ;;  %v4514_v39 = vld [vmem:[%s4763_s3 + $0x38] sm:$0xff] }
 0x144   : > { %2798 = vmatprep.subr.bf16.mxu0 %v2797_v23  ;;  %v1230_v33 = vadd.f32 %v4139_v2, %v1006_v6  ;;  %v1000_v3 = vadd.f32 %v872_v35, %v608_v20  ;;  %v631_v44 = vmul.f32 %v3231_v29, %v5018_v40  ;;  %v887_v28 = vmul.f32 %v4954_v53, %v5019_v17 }
 0x145   : > { %v2829_v59 = vpack.c.bf16 %v1361_v15, %v1353_v16  ;;  %v1350_v9 = vmax.f32 %v1222_v14, 0.0  ;;  %v1008_v50 = vadd.f32 %v880_v60, %v616_v26  ;;  %v895_v18 = vmul.f32 %v4954_v53, %v4236_v21  ;;  %1540 = vmatprep.mubr.f32.mxu0 %v5008_v32  ;;  %1653 = vmatprep.mubr.f32.mxu1 %v5008_v32 }
 0x146   : > { %v1358_v62 = vmax.f32 %v1230_v33, 0.0  ;;  %v1224_v29 = vadd.f32 %v4254_v7, %v1000_v3  ;;  %v1015_v13 = vadd.f32 %v887_v28, %v623_v52  ;;  %v625_v46 = vmul.f32 %v3256_v38, %v5017_v36 }
 0x147   : > { %2830 = vmatprep.subr.bf16.mxu1 %v2829_v59  ;;  %v1232_v31 = vadd.f32 %v4139_v2, %v1008_v50  ;;  %v1023_v53 = vadd.f32 %v895_v18, %v631_v44  ;;  %v633_v34 = vmul.f32 %v3256_v38, %v5018_v40  ;;  %v889_v58 = vmul.f32 %v4956_v45, %v5019_v17 }
 0x148   : > { %v2799_v30 = vpack.c.bf16 %v1358_v62, %v1350_v9  ;;  %v1352_v55 = vmax.f32 %v1224_v29, 0.0  ;;  %v1239_v25 = vadd.f32 %v4275_v43, %v1015_v13  ;;  %v897_v7 = vmul.f32 %v4956_v45, %v4236_v21  ;;  %1541 = vmatmul.mubr.f32.gmra.mrb[14].mxu0 %v4514_v39  ;;  %1654 = vmatmul.mubr.f32.gmra.mrb[14].mxu1 %v4514_v39 }
 0x149   : > { %v1360_v1 = vmax.f32 %v1232_v31, 0.0  ;;  %v1247_v2 = vadd.f32 %v4300_v48, %v1023_v53  ;;  %v1017_v0 = vadd.f32 %v889_v58, %v625_v46  ;;  %v622_v38 = vmul.f32 %v4910_v61, %v5017_v36  ;;  %1724 = vmatprep.mubr.f32.mxu0 %v5008_v32  ;;  %1837 = vmatprep.mubr.f32.mxu1 %v5008_v32 }
 0x14a   : > { %2800 = vmatpush1.bf16.msra.mxu0 %v2799_v30  ;;  %v1367_v41 = vmax.f32 %v1239_v25, 0.0  ;;  %v1025_v57 = vadd.f32 %v897_v7, %v633_v34  ;;  %v630_v45 = vmul.f32 %v4910_v61, %v5018_v40  ;;  %v886_v54 = vmul.f32 %v4964_v42, %v5019_v17 }
 0x14b   : > { %v2831_v51 = vpack.c.bf16 %v1360_v1, %v1352_v55  ;;  %v1375_v10 = vmax.f32 %v1247_v2, 0.0  ;;  %v1241_v37 = vadd.f32 %v4275_v43, %v1017_v0  ;;  %v894_v11 = vmul.f32 %v4964_v42, %v4236_v21 }
 0x14c   : > { %v1249_v47 = vadd.f32 %v4300_v48, %v1025_v57  ;;  %v1014_v20 = vadd.f32 %v886_v54, %v622_v38  ;;  %v624_v27 = vmul.f32 %v4914_v56, %v5017_v36  ;;  %v632_v61 = vmul.f32 %v4914_v56, %v5018_v40 }
 0x14d   : > { %2832 = vmatpush1.bf16.msra.mxu1 %v2831_v51  ;;  %v2801_v63 = vpack.c.bf16 %v1375_v10, %v1367_v41  ;;  %v1022_v26 = vadd.f32 %v894_v11, %v630_v45  ;;  %v888_v23 = vmul.f32 %v4970_v5, %v5019_v17  ;;  %v1369_v16 = vmax.f32 %v1241_v37, 0.0 }
 0x14e   : > { %v1377_v6 = vmax.f32 %v1249_v47, 0.0  ;;  %v1238_v35 = vadd.f32 %v4275_v43, %v1014_v20  ;;  %v896_v42 = vmul.f32 %v4970_v5, %v4236_v21 }
 0x14f   : > { %2802 = vmatprep.subr.bf16.mxu0 %v2801_v63  ;;  %v1246_v15 = vadd.f32 %v4300_v48, %v1022_v26  ;;  %v1016_v14 = vadd.f32 %v888_v23, %v624_v27 }
 0x150   : > { %v2833_v60 = vpack.c.bf16 %v1377_v6, %v1369_v16  ;;  %v1024_v36 = vadd.f32 %v896_v42, %v632_v61  ;;  %v1366_v52 = vmax.f32 %v1238_v35, 0.0 }
 0x151   : > { %v1374_v33 = vmax.f32 %v1246_v15, 0.0  ;;  %v1240_v56 = vadd.f32 %v4275_v43, %v1016_v14 }
 0x152   : > { %2834 = vmatprep.subr.bf16.mxu1 %v2833_v60  ;;  %v1248_v3 = vadd.f32 %v4300_v48, %v1024_v36 }
 0x153   : > { %v2803_v40 = vpack.c.bf16 %v1374_v33, %v1366_v52  ;;  %v1368_v44 = vmax.f32 %v1240_v56, 0.0 }
 0x154   : > { %v1376_v17 = vmax.f32 %v1248_v3, 0.0 }
 0x155   : > { %2804 = vmatpush1.bf16.msra.mxu0 %v2803_v40 }
 0x156   : > { %v2835_v28 = vpack.c.bf16 %v1376_v17, %v1368_v44 }
 0x158   : > { %2836 = vmatpush1.bf16.msra.mxu1 %v2835_v28  ;;  %1725 = vmatmul.mubr.f32.vlgmr.msra.gmra.mrb[16].mxu0 %v4329_v24 }
 0x159   : > { %1730 = vmatprep.mubr.f32.mxu0 %v5008_v32 }
 0x15b   : > { %1838 = vmatmul.mubr.f32.vlgmr.msra.gmra.mrb[16].mxu1 %v4329_v24  ;;  %v4586_v24 = vpop.permute.xlu0 %1396 }
 0x15c   : > { %1843 = vmatprep.mubr.f32.mxu1 %v5008_v32  ;;  %1731 = vmatmul.mubr.f32.gmra.mrb[18].mxu0 %v4354_v49 }
 0x15d   : > { %1736 = vmatprep.mubr.f32.mxu0 %v5008_v32 }
 0x15f   : > { %1844 = vmatmul.mubr.f32.gmra.mrb[18].mxu1 %v4354_v49  ;;  %v4588_v49 = vpop.permute.xlu1 %1401  ;;  %v4598_v41 = vpop.permute.xlu0 %1406 }
 0x160   : > { %1849 = vmatprep.mubr.f32.mxu1 %v5008_v32  ;;  %1737 = vmatmul.mubr.f32.gmra.mrb[20].mxu0 %v4381_v12 }
 0x161   : > { %1742 = vmatprep.mubr.f32.mxu0 %v5008_v32 }
 0x163   : > { %1850 = vmatmul.mubr.f32.gmra.mrb[20].mxu1 %v4381_v12  ;;  %v4600_v54 = vpop.permute.xlu1 %1411  ;;  %v4610_v28 = vpop.permute.xlu0 %1416 }
 0x164   : > { %1855 = vmatprep.mubr.f32.mxu1 %v5008_v32  ;;  %1743 = vmatmul.mubr.f32.gmra.mrb[22].mxu0 %v4408_v19 }
 0x165   : > { %1748 = vmatprep.mubr.f32.mxu0 %v5008_v32 }
 0x167   : > { %1856 = vmatmul.mubr.f32.gmra.mrb[22].mxu1 %v4408_v19 }
 0x168   : > { %1861 = vmatprep.mubr.f32.mxu1 %v5008_v32  ;;  %1749 = vmatmul.mubr.f32.gmra.mrb[24].mxu0 %v4436_v22 }
 0x169   : > { %1754 = vmatprep.mubr.f32.mxu0 %v5008_v32 }
 0x16b   : > { %1862 = vmatmul.mubr.f32.gmra.mrb[24].mxu1 %v4436_v22 }
 0x16c   : > { %1867 = vmatprep.mubr.f32.mxu1 %v5008_v32  ;;  %1755 = vmatmul.mubr.f32.gmra.mrb[26].mxu0 %v4460_v8 }
 0x16d   : > { %1760 = vmatprep.mubr.f32.mxu0 %v5008_v32 }
 0x16f   : > { %1868 = vmatmul.mubr.f32.gmra.mrb[26].mxu1 %v4460_v8 }
 0x170   : > { %1873 = vmatprep.mubr.f32.mxu1 %v5008_v32  ;;  %1761 = vmatmul.mubr.f32.gmra.mrb[28].mxu0 %v4483_v4 }
 0x171   : > { %1766 = vmatprep.mubr.f32.mxu0 %v5008_v32 }
 0x173   : > { %1874 = vmatmul.mubr.f32.gmra.mrb[28].mxu1 %v4483_v4 }
 0x174   : > { %1879 = vmatprep.mubr.f32.mxu1 %v5008_v32  ;;  %1767 = vmatmul.mubr.f32.gmra.mrb[30].mxu0 %v4514_v39 }
 0x175   : > { %2035 = vmatprep.mubr.f32.mxu0 %v5008_v32 }
 0x177   : > { %1880 = vmatmul.mubr.f32.gmra.mrb[30].mxu1 %v4514_v39 }
 0x178   : > { %2112 = vmatprep.mubr.f32.mxu1 %v5008_v32 }
 0x1fe   : > { %v1500_v5 = vpop.f32.mrb[0].mxu0  ;;  %v1613_v21 = vpop.f32.mrb[0].mxu1 }
 0x1ff   : > { %v1502_v43 = vpop.f32.mrb[1].mxu0  ;;  %v1615_v48 = vpop.f32.mrb[1].mxu1  ;;  %v1501_v12 = vadd.f32 %v1500_v5, %v4586_v24  ;;  %v1614_v19 = vadd.f32 %v1613_v21, %v4586_v24 }
 0x200   : > { %v1503_v22 = vadd.f32 %v1502_v43, %v4586_v24  ;;  %v1616_v8 = vadd.f32 %v1615_v48, %v4586_v24  ;;  %v4612_v43 = vpop.permute.xlu1 %1421 }
 0x201   : > { %v1886_v13 = vmax.f32 %v1501_v12, 0.0  ;;  %v1888_v46 = vmax.f32 %v1614_v19, 0.0 }
 0x202   : > { %v1506_v4 = vpop.f32.mrb[2].mxu0  ;;  %v1619_v59 = vpop.f32.mrb[2].mxu1  ;;  %v1887_v34 = vmax.f32 %v1503_v22, 0.0  ;;  %v1889_v58 = vmax.f32 %v1616_v8, 0.0 }
 0x203   : > { %v1507_v9 = vadd.f32 %v1506_v4, %v4588_v49  ;;  %v1620_v50 = vadd.f32 %v1619_v59, %v4588_v49  ;;  %v1508_v18 = vpop.f32.mrb[3].mxu0  ;;  %v1621_v39 = vpop.f32.mrb[3].mxu1 }
 0x204   : > { %v1509_v62 = vadd.f32 %v1508_v18, %v4588_v49  ;;  %v1622_v29 = vadd.f32 %v1621_v39, %v4588_v49 }
 0x205   : > { %v1894_v31 = vmax.f32 %v1507_v9, 0.0  ;;  %v1896_v53 = vmax.f32 %v1620_v50, 0.0 }
 0x206   : > { %v1895_v30 = vmax.f32 %v1509_v62, 0.0  ;;  %v1897_v55 = vmax.f32 %v1622_v29, 0.0  ;;  %v1512_v25 = vpop.f32.mrb[4].mxu0  ;;  %v1625_v7 = vpop.f32.mrb[4].mxu1 }
 0x207   : > { %v2839_v1 = vpack.c.bf16 %v1894_v31, %v1886_v13  ;;  %v2855_v2 = vpack.c.bf16 %v1896_v53, %v1888_v46  ;;  %v1514_v0 = vpop.f32.mrb[5].mxu0  ;;  %v1627_v38 = vpop.f32.mrb[5].mxu1  ;;  %v1513_v51 = vadd.f32 %v1512_v25, %v4598_v41  ;;  %v1626_v10 = vadd.f32 %v1625_v7, %v4598_v41 }
 0x208   : > { %v2837_v57 = vpack.c.bf16 %v1895_v30, %v1887_v34  ;;  %v2853_v45 = vpack.c.bf16 %v1897_v55, %v1889_v58  ;;  %v1515_v37 = vadd.f32 %v1514_v0, %v4598_v41  ;;  %v1628_v11 = vadd.f32 %v1627_v38, %v4598_v41 }
 0x209   : > { %v1902_v6 = vmax.f32 %v1513_v51, 0.0  ;;  %v1904_v35 = vmax.f32 %v1626_v10, 0.0  ;;  %v4624_v51 = vpop.permute.xlu1 %1431 }
 0x20a   : > { %v1518_v47 = vpop.f32.mrb[6].mxu0  ;;  %v1631_v20 = vpop.f32.mrb[6].mxu1  ;;  %2838 = vmatprep.subr.bf16.mxu0 %v2837_v57  ;;  %2854 = vmatprep.subr.bf16.mxu1 %v2853_v45  ;;  %v1903_v14 = vmax.f32 %v1515_v37, 0.0  ;;  %v1905_v60 = vmax.f32 %v1628_v11, 0.0 }
 0x20b   : > { %v1519_v27 = vadd.f32 %v1518_v47, %v4600_v54  ;;  %v1632_v63 = vadd.f32 %v1631_v20, %v4600_v54  ;;  %v1520_v26 = vpop.f32.mrb[7].mxu0  ;;  %v1633_v61 = vpop.f32.mrb[7].mxu1  ;;  %2840 = vmatpush1.bf16.msra.mxu0 %v2839_v1  ;;  %2856 = vmatpush1.bf16.msra.mxu1 %v2855_v2 }
 0x20c   : > { %v1521_v23 = vadd.f32 %v1520_v26, %v4600_v54  ;;  %v1634_v16 = vadd.f32 %v1633_v61, %v4600_v54  ;;  %v4622_v45 = vpop.permute.xlu0 %1426 }
 0x20d   : > { %v1910_v42 = vmax.f32 %v1519_v27, 0.0  ;;  %v1912_v15 = vmax.f32 %v1632_v63, 0.0 }
 0x20e   : > { %v1911_v36 = vmax.f32 %v1521_v23, 0.0  ;;  %v1913_v52 = vmax.f32 %v1634_v16, 0.0  ;;  %v1524_v33 = vpop.f32.mrb[8].mxu0  ;;  %v1637_v56 = vpop.f32.mrb[8].mxu1 }
 0x20f   : > { %v2843_v3 = vpack.c.bf16 %v1910_v42, %v1902_v6  ;;  %v2859_v40 = vpack.c.bf16 %v1912_v15, %v1904_v35  ;;  %v1526_v44 = vpop.f32.mrb[9].mxu0  ;;  %v1639_v17 = vpop.f32.mrb[9].mxu1  ;;  %v1525_v48 = vadd.f32 %v1524_v33, %v4610_v28  ;;  %v1638_v12 = vadd.f32 %v1637_v56, %v4610_v28 }
 0x210   : > { %v2841_v5 = vpack.c.bf16 %v1911_v36, %v1903_v14  ;;  %v2857_v21 = vpack.c.bf16 %v1913_v52, %v1905_v60  ;;  %v1527_v19 = vadd.f32 %v1526_v44, %v4610_v28  ;;  %v1640_v22 = vadd.f32 %v1639_v17, %v4610_v28  ;;  %v4637_v17 = vld [vmem:[%s4765_s5] sm:$0xff] }
 0x211   : > { %v1918_v29 = vmax.f32 %v1525_v48, 0.0  ;;  %v1920_v13 = vmax.f32 %v1638_v12, 0.0 }
 0x212   : > { %v1530_v8 = vpop.f32.mrb[10].mxu0  ;;  %v1643_v4 = vpop.f32.mrb[10].mxu1  ;;  %2842 = vmatprep.subr.bf16.mxu0 %v2841_v5  ;;  %2858 = vmatprep.subr.bf16.mxu1 %v2857_v21  ;;  %v1919_v53 = vmax.f32 %v1527_v19, 0.0  ;;  %v1921_v34 = vmax.f32 %v1640_v22, 0.0  ;;  %v4648_v5 = vld [vmem:[%s4765_s5 + $0x8] sm:$0xff] }
 0x213   : > { %v1531_v59 = vadd.f32 %v1530_v8, %v4612_v43  ;;  %v1644_v9 = vadd.f32 %v1643_v4, %v4612_v43  ;;  %v1532_v50 = vpop.f32.mrb[11].mxu0  ;;  %v1645_v18 = vpop.f32.mrb[11].mxu1  ;;  %2844 = vmatpush1.bf16.msra.mxu0 %v2843_v3  ;;  %2860 = vmatpush1.bf16.msra.mxu1 %v2859_v40 }
 0x214   : > { %v1533_v39 = vadd.f32 %v1532_v50, %v4612_v43  ;;  %v1646_v62 = vadd.f32 %v1645_v18, %v4612_v43 }
 0x215   : > { %v1926_v46 = vmax.f32 %v1531_v59, 0.0  ;;  %v1928_v31 = vmax.f32 %v1644_v9, 0.0 }
 0x216   : > { %v1927_v58 = vmax.f32 %v1533_v39, 0.0  ;;  %v1929_v30 = vmax.f32 %v1646_v62, 0.0  ;;  %v1536_v55 = vpop.f32.mrb[12].mxu0  ;;  %v1649_v25 = vpop.f32.mrb[12].mxu1 }
 0x217   : > { %v2847_v7 = vpack.c.bf16 %v1926_v46, %v1918_v29  ;;  %v2863_v1 = vpack.c.bf16 %v1928_v31, %v1920_v13  ;;  %v1538_v2 = vpop.f32.mrb[13].mxu0  ;;  %v1651_v0 = vpop.f32.mrb[13].mxu1  ;;  %v1537_v10 = vadd.f32 %v1536_v55, %v4622_v45  ;;  %v1650_v37 = vadd.f32 %v1649_v25, %v4622_v45 }
 0x218   : > { %v2845_v38 = vpack.c.bf16 %v1927_v58, %v1919_v53  ;;  %v2861_v57 = vpack.c.bf16 %v1929_v30, %v1921_v34  ;;  %v1539_v11 = vadd.f32 %v1538_v2, %v4622_v45  ;;  %v1652_v47 = vadd.f32 %v1651_v0, %v4622_v45 }
 0x219   : > { %v1934_v35 = vmax.f32 %v1537_v10, 0.0  ;;  %v1936_v42 = vmax.f32 %v1650_v37, 0.0 }
 0x21a   : > { %2846 = vmatprep.subr.bf16.mxu0 %v2845_v38  ;;  %2862 = vmatprep.subr.bf16.mxu1 %v2861_v57  ;;  %v1935_v60 = vmax.f32 %v1539_v11, 0.0  ;;  %v1937_v36 = vmax.f32 %v1652_v47, 0.0 }
 0x21b   : > { %v1542_v20 = vpop.f32.mrb[14].mxu0  ;;  %v1655_v27 = vpop.f32.mrb[14].mxu1  ;;  %2848 = vmatpush1.bf16.msra.mxu0 %v2847_v7  ;;  %2864 = vmatpush1.bf16.msra.mxu1 %v2863_v1 }
 0x21c   : > { %v1543_v63 = vadd.f32 %v1542_v20, %v4624_v51  ;;  %v1656_v26 = vadd.f32 %v1655_v27, %v4624_v51  ;;  %v1544_v61 = vpop.f32.mrb[15].mxu0  ;;  %v1657_v23 = vpop.f32.mrb[15].mxu1 }
 0x21d   : > { %v1545_v16 = vadd.f32 %v1544_v61, %v4624_v51  ;;  %v1658_v6 = vadd.f32 %v1657_v23, %v4624_v51 }
 0x21e   : > { %v1942_v15 = vmax.f32 %v1543_v63, 0.0  ;;  %v1944_v14 = vmax.f32 %v1656_v26, 0.0 }
 0x21f   : > { %v1943_v52 = vmax.f32 %v1545_v16, 0.0  ;;  %v1945_v33 = vmax.f32 %v1658_v6, 0.0 }
 0x220   : > { %v2851_v56 = vpack.c.bf16 %v1942_v15, %v1934_v35  ;;  %v2867_v3 = vpack.c.bf16 %v1944_v14, %v1936_v42 }
 0x221   : > { %v2849_v40 = vpack.c.bf16 %v1943_v52, %v1935_v60  ;;  %v2865_v44 = vpack.c.bf16 %v1945_v33, %v1937_v36 }
 0x223   : > { %2850 = vmatprep.subr.bf16.mxu0 %v2849_v40  ;;  %2866 = vmatprep.subr.bf16.mxu1 %v2865_v44 }
 0x224   : > { %2852 = vmatpush1.bf16.msra.mxu0 %v2851_v56  ;;  %2868 = vmatpush1.bf16.msra.mxu1 %v2867_v3 }
 0x227   : > { %2691 = vmatmul.mubr.msk.f32.vlgmr.msra.gmra.mrb[32].mxu0 %vm1964_vm0, %v4637_v17  ;;  %2693 = vmatmul.mubr.msk.f32.vlgmr.msra.gmra.mrb[32].mxu1 %vm1964_vm0, %v4637_v17 }
 0x228   : > { %2041 = vmatprep.mubr.f32.mxu0 %v5008_v32  ;;  %2118 = vmatprep.mubr.f32.mxu1 %v5008_v32 }
 0x22b   : > { %v1726_v21 = vpop.f32.mrb[16].mxu0  ;;  %2692 = vmatmul.mubr.msk.f32.gmra.mrb[34].mxu0 %vm1964_vm0, %v4648_v5  ;;  %2694 = vmatmul.mubr.msk.f32.gmra.mrb[34].mxu1 %vm1964_vm0, %v4648_v5 }
 0x22c   : > { %v1728_v48 = vpop.f32.mrb[17].mxu0  ;;  %2189 = vmatprep.mubr.f32.mxu0 %v5008_v32  ;;  %2266 = vmatprep.mubr.f32.mxu1 %v5008_v32  ;;  %v1727_v12 = vadd.f32 %v1726_v21, %v4586_v24 }
 0x22d   : > { %v1729_v22 = vadd.f32 %v1728_v48, %v4586_v24 }
 0x22e   : > { %v1839_v19 = vpop.f32.mrb[16].mxu1  ;;  %v1890_v39 = vmax.f32 %v1727_v12, 0.0 }
 0x22f   : > { %v1841_v8 = vpop.f32.mrb[17].mxu1  ;;  %v1732_v4 = vpop.f32.mrb[18].mxu0  ;;  %v1840_v50 = vadd.f32 %v1839_v19, %v4586_v24  ;;  %v1891_v46 = vmax.f32 %v1729_v22, 0.0 }
 0x230   : > { %v1733_v59 = vadd.f32 %v1732_v4, %v4588_v49  ;;  %v1734_v9 = vpop.f32.mrb[19].mxu0  ;;  %v1842_v62 = vadd.f32 %v1841_v8, %v4586_v24 }
 0x231   : > { %v1735_v18 = vadd.f32 %v1734_v9, %v4588_v49  ;;  %v1892_v7 = vmax.f32 %v1840_v50, 0.0 }
 0x232   : > { %v1898_v29 = vmax.f32 %v1733_v59, 0.0  ;;  %v1845_v13 = vpop.f32.mrb[18].mxu1  ;;  %v1893_v0 = vmax.f32 %v1842_v62, 0.0 }
 0x233   : > { %v1846_v31 = vadd.f32 %v1845_v13, %v4588_v49  ;;  %v1899_v53 = vmax.f32 %v1735_v18, 0.0  ;;  %v1847_v34 = vpop.f32.mrb[19].mxu1  ;;  %v1738_v58 = vpop.f32.mrb[20].mxu0 }
 0x234   : > { %v2871_v30 = vpack.c.bf16 %v1898_v29, %v1890_v39  ;;  %v1848_v55 = vadd.f32 %v1847_v34, %v4588_v49  ;;  %v1740_v25 = vpop.f32.mrb[21].mxu0  ;;  %v1739_v57 = vadd.f32 %v1738_v58, %v4598_v41 }
 0x235   : > { %v1900_v1 = vmax.f32 %v1846_v31, 0.0  ;;  %v2869_v2 = vpack.c.bf16 %v1899_v53, %v1891_v46  ;;  %v1741_v37 = vadd.f32 %v1740_v25, %v4598_v41 }
 0x236   : > { %v1901_v38 = vmax.f32 %v1848_v55, 0.0  ;;  %v1851_v24 = vpop.f32.mrb[20].mxu1  ;;  %v1906_v61 = vmax.f32 %v1739_v57, 0.0 }
 0x237   : > { %v2887_v10 = vpack.c.bf16 %v1900_v1, %v1892_v7  ;;  %v1853_v11 = vpop.f32.mrb[21].mxu1  ;;  %v1744_v47 = vpop.f32.mrb[22].mxu0  ;;  %2870 = vmatprep.subr.bf16.mxu0 %v2869_v2  ;;  %v1852_v49 = vadd.f32 %v1851_v24, %v4598_v41  ;;  %v1907_v35 = vmax.f32 %v1741_v37, 0.0 }
 0x238   : > { %v2885_v20 = vpack.c.bf16 %v1901_v38, %v1893_v0  ;;  %v1745_v27 = vadd.f32 %v1744_v47, %v4600_v54  ;;  %v1746_v63 = vpop.f32.mrb[23].mxu0  ;;  %2872 = vmatpush1.bf16.msra.mxu0 %v2871_v30  ;;  %v1854_v23 = vadd.f32 %v1853_v11, %v4598_v41 }
 0x239   : > { %v1747_v26 = vadd.f32 %v1746_v63, %v4600_v54  ;;  %v1908_v56 = vmax.f32 %v1852_v49, 0.0 }
 0x23a   : > { %v1914_v16 = vmax.f32 %v1745_v27, 0.0  ;;  %v1857_v6 = vpop.f32.mrb[22].mxu1  ;;  %2886 = vmatprep.subr.bf16.mxu1 %v2885_v20  ;;  %v1909_v44 = vmax.f32 %v1854_v23, 0.0 }
 0x23b   : > { %v1858_v42 = vadd.f32 %v1857_v6, %v4600_v54  ;;  %v1915_v15 = vmax.f32 %v1747_v26, 0.0  ;;  %v1859_v14 = vpop.f32.mrb[23].mxu1  ;;  %2888 = vmatpush1.bf16.msra.mxu1 %v2887_v10  ;;  %v1750_v60 = vpop.f32.mrb[24].mxu0 }
 0x23c   : > { %v2875_v36 = vpack.c.bf16 %v1914_v16, %v1906_v61  ;;  %v1860_v52 = vadd.f32 %v1859_v14, %v4600_v54  ;;  %v1752_v33 = vpop.f32.mrb[25].mxu0  ;;  %v1751_v41 = vadd.f32 %v1750_v60, %v4610_v28 }
 0x23d   : > { %v1916_v3 = vmax.f32 %v1858_v42, 0.0  ;;  %v2873_v40 = vpack.c.bf16 %v1915_v15, %v1907_v35  ;;  %v1753_v19 = vadd.f32 %v1752_v33, %v4610_v28 }
 0x23e   : > { %v1917_v21 = vmax.f32 %v1860_v52, 0.0  ;;  %v1863_v48 = vpop.f32.mrb[24].mxu1  ;;  %v1922_v18 = vmax.f32 %v1751_v41, 0.0  ;;  %v1962_v41 = vpop.permute.xlu1 %1961 }
 0x23f   : > { %v2891_v12 = vpack.c.bf16 %v1916_v3, %v1908_v56  ;;  %v1865_v22 = vpop.f32.mrb[25].mxu1  ;;  %v1756_v8 = vpop.f32.mrb[26].mxu0  ;;  %2874 = vmatprep.subr.bf16.mxu0 %v2873_v40  ;;  %v1864_v54 = vadd.f32 %v1863_v48, %v4610_v28  ;;  %v1923_v13 = vmax.f32 %v1753_v19, 0.0 }
 0x240   : > { %v2889_v4 = vpack.c.bf16 %v1917_v21, %v1909_v44  ;;  %v1757_v59 = vadd.f32 %v1756_v8, %v4612_v43  ;;  %v1758_v9 = vpop.f32.mrb[27].mxu0  ;;  %2876 = vmatpush1.bf16.msra.mxu0 %v2875_v36  ;;  %v1866_v39 = vadd.f32 %v1865_v22, %v4610_v28  ;;  %v1957_v21 = vpop.permute.xlu0 %1956 }
 0x241   : > { %v1759_v50 = vadd.f32 %v1758_v9, %v4612_v43  ;;  %v1924_v25 = vmax.f32 %v1864_v54, 0.0 }
 0x242   : > { %v1930_v62 = vmax.f32 %v1757_v59, 0.0  ;;  %v1869_v29 = vpop.f32.mrb[26].mxu1  ;;  %2890 = vmatprep.subr.bf16.mxu1 %v2889_v4  ;;  %v1925_v2 = vmax.f32 %v1866_v39, 0.0 }
 0x243   : > { %v1870_v46 = vadd.f32 %v1869_v29, %v4612_v43  ;;  %v1931_v31 = vmax.f32 %v1759_v50, 0.0  ;;  %v1871_v53 = vpop.f32.mrb[27].mxu1  ;;  %2892 = vmatpush1.bf16.msra.mxu1 %v2891_v12  ;;  %v1762_v34 = vpop.f32.mrb[28].mxu0 }
 0x244   : > { %v2879_v58 = vpack.c.bf16 %v1930_v62, %v1922_v18  ;;  %v1872_v30 = vadd.f32 %v1871_v53, %v4612_v43  ;;  %v1764_v55 = vpop.f32.mrb[29].mxu0  ;;  %v1763_v28 = vadd.f32 %v1762_v34, %v4622_v45 }
 0x245   : > { %v1932_v7 = vmax.f32 %v1870_v46, 0.0  ;;  %v2877_v1 = vpack.c.bf16 %v1931_v31, %v1923_v13  ;;  %v1765_v24 = vadd.f32 %v1764_v55, %v4622_v45 }
 0x246   : > { %v1933_v0 = vmax.f32 %v1872_v30, 0.0  ;;  %v1875_v38 = vpop.f32.mrb[28].mxu1  ;;  %v1938_v63 = vmax.f32 %v1763_v28, 0.0 }
 0x247   : > { %v2895_v57 = vpack.c.bf16 %v1932_v7, %v1924_v25  ;;  %v1877_v10 = vpop.f32.mrb[29].mxu1  ;;  %v1768_v37 = vpop.f32.mrb[30].mxu0  ;;  %2878 = vmatprep.subr.bf16.mxu0 %v2877_v1  ;;  %v1876_v43 = vadd.f32 %v1875_v38, %v4622_v45  ;;  %v1939_v23 = vmax.f32 %v1765_v24, 0.0  ;;  %v2295_v25 = vld [vmem:[%s4767_s7] sm:$0x7] }
 0x248   : > { %v2893_v11 = vpack.c.bf16 %v1933_v0, %v1925_v2  ;;  %v1769_v47 = vadd.f32 %v1768_v37, %v4624_v51  ;;  %v1770_v20 = vpop.f32.mrb[31].mxu0  ;;  %2880 = vmatpush1.bf16.msra.mxu0 %v2879_v58  ;;  %v1878_v49 = vadd.f32 %v1877_v10, %v4622_v45 }
 0x249   : > { %v1771_v27 = vadd.f32 %v1770_v20, %v4624_v51  ;;  %v1940_v14 = vmax.f32 %v1876_v43, 0.0 }
 0x24a   : > { %v1946_v26 = vmax.f32 %v1769_v47, 0.0  ;;  %v1881_v61 = vpop.f32.mrb[30].mxu1  ;;  %2894 = vmatprep.subr.bf16.mxu1 %v2893_v11  ;;  %v1941_v52 = vmax.f32 %v1878_v49, 0.0 }
 0x24b   : > { %v1882_v16 = vadd.f32 %v1881_v61, %v4624_v51  ;;  %v1947_v6 = vmax.f32 %v1771_v27, 0.0  ;;  %v1883_v35 = vpop.f32.mrb[31].mxu1  ;;  %2896 = vmatpush1.bf16.msra.mxu1 %v2895_v57 }
 0x24c   : > { %v2883_v42 = vpack.c.bf16 %v1946_v26, %v1938_v63  ;;  %v1884_v15 = vadd.f32 %v1883_v35, %v4624_v51 }
 0x24d   : > { %v1948_v60 = vmax.f32 %v1882_v16, 0.0  ;;  %v2881_v36 = vpack.c.bf16 %v1947_v6, %v1939_v23 }
 0x24e   : > { %v1949_v33 = vmax.f32 %v1884_v15, 0.0 }
 0x24f   : > { %v2899_v56 = vpack.c.bf16 %v1948_v60, %v1940_v14  ;;  %2882 = vmatprep.subr.bf16.mxu0 %v2881_v36  ;;  %v2300_v36 = vpop.permute.xlu0 %2299 }
 0x250   : > { %v2897_v45 = vpack.c.bf16 %v1949_v33, %v1941_v52  ;;  %2884 = vmatpush1.bf16.msra.mxu0 %v2883_v42 }
 0x252   : > { %2898 = vmatprep.subr.bf16.mxu1 %v2897_v45 }
 0x253   : > { %2900 = vmatpush1.bf16.msra.mxu1 %v2899_v56  ;;  %2695 = vmatmul.mubr.msk.f32.vlgmr.msra.gmra.mrb[36].mxu0 %vm1964_vm0, %v4637_v17 }
 0x254   : > { %2195 = vmatprep.mubr.f32.mxu0 %v5008_v32 }
 0x256   : > { %2697 = vmatmul.mubr.msk.f32.vlgmr.msra.gmra.mrb[36].mxu1 %vm1964_vm0, %v4637_v17 }
 0x257   : > { %2272 = vmatprep.mubr.f32.mxu1 %v5008_v32  ;;  %2696 = vmatmul.mubr.msk.f32.gmra.mrb[38].mxu0 %vm1964_vm0, %v4648_v5 }
 0x258   : > { %2370 = vmatprep.mubr.f32.mxu0 %v5008_v32 }
 0x25a   : > { %2698 = vmatmul.mubr.msk.f32.gmra.mrb[38].mxu1 %vm1964_vm0, %v4648_v5 }
 0x25b   : > { %2441 = vmatprep.mubr.f32.mxu1 %v5008_v32 }
 0x2fa   : > { %v2037_v51 = vpop.f32.mrb[32].mxu0  ;;  %v2114_v3 = vpop.f32.mrb[32].mxu1 }
 0x2fb   : > { %v2039_v40 = vpop.f32.mrb[33].mxu0  ;;  %v2116_v44 = vpop.f32.mrb[33].mxu1  ;;  %v2038_v48 = vadd.f32 %v2037_v51, %v1957_v21  ;;  %v2115_v17 = vadd.f32 %v2114_v3, %v1957_v21 }
 0x2fc   : > { %v2040_v12 = vadd.f32 %v2039_v40, %v1957_v21  ;;  %v2117_v19 = vadd.f32 %v2116_v44, %v1957_v21 }
 0x2fd   : > { %v2279_v18 = vmax.f32 %v2038_v48, 0.0  ;;  %v2281_v39 = vmax.f32 %v2115_v17, 0.0 }
 0x2fe   : > { %v2043_v22 = vpop.f32.mrb[34].mxu0  ;;  %v2120_v8 = vpop.f32.mrb[34].mxu1  ;;  %v2280_v13 = vmax.f32 %v2040_v12, 0.0  ;;  %v2282_v46 = vmax.f32 %v2117_v19, 0.0 }
 0x2ff   : > { %v2044_v4 = vadd.f32 %v2043_v22, %v1962_v41  ;;  %v2121_v59 = vadd.f32 %v2120_v8, %v1962_v41  ;;  %v2045_v9 = vpop.f32.mrb[35].mxu0  ;;  %v2122_v54 = vpop.f32.mrb[35].mxu1 }
 0x300   : > { %v2046_v50 = vadd.f32 %v2045_v9, %v1962_v41  ;;  %v2123_v5 = vadd.f32 %v2122_v54, %v1962_v41 }
 0x301   : > { %v2287_v62 = vmax.f32 %v2044_v4, 0.0  ;;  %v2289_v29 = vmax.f32 %v2121_v59, 0.0 }
 0x302   : > { %v2288_v31 = vmax.f32 %v2046_v50, 0.0  ;;  %v2290_v53 = vmax.f32 %v2123_v5, 0.0 }
 0x303   : > { %v2903_v34 = vpack.c.bf16 %v2287_v62, %v2279_v18  ;;  %v2907_v58 = vpack.c.bf16 %v2289_v29, %v2281_v39 }
 0x304   : > { %v2901_v30 = vpack.c.bf16 %v2288_v31, %v2280_v13  ;;  %v2905_v55 = vpack.c.bf16 %v2290_v53, %v2282_v46 }
 0x306   : > { %2902 = vmatprep.subr.bf16.mxu0 %v2901_v30  ;;  %2906 = vmatprep.subr.bf16.mxu1 %v2905_v55 }
 0x307   : > { %2904 = vmatpush1.bf16.msra.mxu0 %v2903_v34  ;;  %2908 = vmatpush1.bf16.msra.mxu1 %v2907_v58 }
 0x30a   : > { %2699 = vmatmul.mubr.msk.f32.vlgmr.msra.gmra.mrb[40].mxu0 %vm2302_vm1, %v2295_v25  ;;  %2700 = vmatmul.mubr.msk.f32.vlgmr.msra.gmra.mrb[40].mxu1 %vm2302_vm1, %v2295_v25 }
 0x30b   : > { %2512 = vmatprep.mubr.f32.mxu0 %v5008_v32  ;;  %2583 = vmatprep.mubr.f32.mxu1 %v5008_v32 }
 0x326   : > { %v2191_v7 = vpop.f32.mrb[36].mxu0 }
 0x327   : > { %v2193_v1 = vpop.f32.mrb[37].mxu0  ;;  %v2192_v2 = vadd.f32 %v2191_v7, %v1957_v21 }
 0x328   : > { %v2194_v28 = vadd.f32 %v2193_v1, %v1957_v21 }
 0x329   : > { %v2268_v0 = vpop.f32.mrb[36].mxu1  ;;  %v2283_v47 = vmax.f32 %v2192_v2, 0.0 }
 0x32a   : > { %v2270_v38 = vpop.f32.mrb[37].mxu1  ;;  %v2197_v57 = vpop.f32.mrb[38].mxu0  ;;  %v2269_v37 = vadd.f32 %v2268_v0, %v1957_v21  ;;  %v2284_v63 = vmax.f32 %v2194_v28, 0.0 }
 0x32b   : > { %v2198_v24 = vadd.f32 %v2197_v57, %v1962_v41  ;;  %v2199_v10 = vpop.f32.mrb[39].mxu0  ;;  %v2271_v20 = vadd.f32 %v2270_v38, %v1957_v21 }
 0x32c   : > { %v2200_v11 = vadd.f32 %v2199_v10, %v1962_v41  ;;  %v2285_v16 = vmax.f32 %v2269_v37, 0.0 }
 0x32d   : > { %v2291_v43 = vmax.f32 %v2198_v24, 0.0  ;;  %v2274_v27 = vpop.f32.mrb[38].mxu1  ;;  %v2286_v42 = vmax.f32 %v2271_v20, 0.0 }
 0x32e   : > { %v2275_v49 = vadd.f32 %v2274_v27, %v1962_v41  ;;  %v2292_v26 = vmax.f32 %v2200_v11, 0.0  ;;  %v2276_v61 = vpop.f32.mrb[39].mxu1 }
 0x32f   : > { %v2911_v32 = vpack.c.bf16 %v2291_v43, %v2283_v47  ;;  %v2277_v23 = vadd.f32 %v2276_v61, %v1962_v41 }
 0x330   : > { %v2293_v6 = vmax.f32 %v2275_v49, 0.0  ;;  %v2909_v35 = vpack.c.bf16 %v2292_v26, %v2284_v63 }
 0x331   : > { %v2294_v15 = vmax.f32 %v2277_v23, 0.0 }
 0x332   : > { %v2915_v14 = vpack.c.bf16 %v2293_v6, %v2285_v16  ;;  %2910 = vmatprep.subr.bf16.mxu0 %v2909_v35 }
 0x333   : > { %v2913_v60 = vpack.c.bf16 %v2294_v15, %v2286_v42  ;;  %2912 = vmatpush1.bf16.msra.mxu0 %v2911_v32 }
 0x335   : > { %2914 = vmatprep.subr.bf16.mxu1 %v2913_v60 }
 0x336   : > { %2916 = vmatpush1.bf16.msra.mxu1 %v2915_v14  ;;  %2701 = vmatmul.mubr.msk.f32.vlgmr.msra.gmra.mrb[42].mxu0 %vm2302_vm1, %v2295_v25 }
 0x339   : > { %2702 = vmatmul.mubr.msk.f32.vlgmr.msra.gmra.mrb[42].mxu1 %vm2302_vm1, %v2295_v25 }
 0x3dd   : > { %v2372_v52 = vpop.f32.mrb[40].mxu0  ;;  %v2443_v33 = vpop.f32.mrb[40].mxu1 }
 0x3de   : > { %v2373_v56 = vadd.f32 %v2372_v52, %v2300_v36  ;;  %v2444_v45 = vadd.f32 %v2443_v33, %v2300_v36  ;;  %v2374_v51 = vpop.f32.mrb[41].mxu0  ;;  %v2445_v3 = vpop.f32.mrb[41].mxu1 }
 0x3df   : > { %v2375_v40 = vadd.f32 %v2374_v51, %v2300_v36  ;;  %v2446_v44 = vadd.f32 %v2445_v3, %v2300_v36 }
 0x3e1   : > { %v2598_v21 = vcombine.low %v2373_v56, %v2375_v40  ;;  %v2599_v41 = vcombine.low %v2444_v45, %v2446_v44 }
 0x3e3   : > { %2606 = vst [vmem:[%s326_s28] sm:$0x77] %v2598_v21  ;;  %2607 = vst [vmem:[%s326_s28 + $0x8] sm:$0x77] %v2599_v41 }
 0x409   : > { %v2514_v48 = vpop.f32.mrb[42].mxu0 }
 0x40a   : > { %v2515_v17 = vadd.f32 %v2514_v48, %v2300_v36  ;;  %v2516_v12 = vpop.f32.mrb[43].mxu0 }
 0x40b   : > { %v2517_v19 = vadd.f32 %v2516_v12, %v2300_v36 }
 0x40c   : > { %v2585_v22 = vpop.f32.mrb[42].mxu1 }
 0x40d   : > { %v2586_v8 = vadd.f32 %v2585_v22, %v2300_v36  ;;  %v2600_v4 = vcombine.low %v2515_v17, %v2517_v19  ;;  %v2587_v59 = vpop.f32.mrb[43].mxu1 }
 0x40e   : > { %v2588_v9 = vadd.f32 %v2587_v59, %v2300_v36 }
 0x40f   : > { %2608 = vst [vmem:[%s326_s28 + $0x10] sm:$0x77] %v2600_v4 }
 0x410   : > { %v2601_v54 = vcombine.low %v2586_v8, %v2588_v9 }
 0x412   : > { %2609 = vst [vmem:[%s326_s28 + $0x18] sm:$0x77] %v2601_v54 }
 0x413   : > { %2990 = shalt.err (!%p2987_p3)
}
 0x414   : > { %s2991_s16 = scalar_lea.hbm %s4716_s26, 512  ;;  %s2995_s21 = scalar_lea.hbm %s4769_s9, 1024 }
 0x415   : > { %p2992_p4 = scmp.ne.s32.totalorder %s4716_s26, %s2991_s16  ;;  %p2996_p9 = scmp.lt.u32.totalorder %s4716_s26, %s4769_s9 }
 0x416   : > { %p2997_p10 = scmp.lt.u32.totalorder %s2995_s21, %s2991_s16  ;;  %p2999_p12 = scmp.lt.u32.totalorder %s2991_s16, %s4716_s26 }
 0x417   : > { %p2993_p7 = pnand %p2992_p4, %p3133_p5 }
 0x418   : > { %p2998_p11 = por %p2997_p10, %p2996_p9 }
 0x419   : > { %p2994_p8 = pneg %p2993_p7 }
 0x41a   : > { %p3000_p13 = por %p2999_p12, %p2998_p11 }
 0x41c   : > { %p3001_p0 = pnand %p3000_p13, %p2994_p8 }
 0x41e   : > { %3004 = shalt.err (!%p3001_p0)
}
 0x41f   : > { %2917 = dma.vmem_to_hbm [thread:$0]  (%p3133_p5), %s4718_s22, 512, %s4716_s26, %s2611_s27  }
 0x420 PF: > { %p2923_p1 = scmp.ge.s32.totalorder %s3039_s12, 2  ;;  %s2637_s25 = sand.u32 1, %s3027_s30  }
 0x421   : > { %s2638_s13 = scalar_lea.sflag [#allocation3], %s2637_s25 }
 0x422   : > { %p2920_p2 = pnand %p2923_p1, %p3137_p6 }
 0x424   : > { %3022 = dma.done.wait (!%p2920_p2), %s2638_s13, 512  }
 0x425   : > { %3024 = vsyncadd (!%p2920_p2), %s2638_s13, 4294966784  ;;  %p19_p3 = scmp.ge.s32.totalorder %s3120_s15, 4   ;;  %s5020_s30 = smov %s3031_s10 }
 0x426   : > { %s5021_s10 = smov %s3035_s11  ;;  %s5022_s11 = smov %s3131_s18 }
 0x427   : > { %s5023_s12 = smov %s3120_s15  ;;  %21 = sbr.rel (!%p19_p3) target bundleno = 3 (0x3), region = 91 }
 0x42e   :  { %2643 = vsyncpa [#allocation3], 1 }
 0x42f   :  { %2645 = vsyncpa [#allocation3 + $0x1], 1 }

</bundles_post_ra>
